<compile_context>
chip_gen: v5e
topology: v5e:2x2
jax: 0.10.0
libtpu: 0.0.40
codegen_flags: <defaults>
</compile_context>

<pallas_src>
import functools
import math

import jax
import jax.numpy as jnp
from jax.experimental import pallas as pl
from jax.experimental.pallas import tpu as pltpu

BN_EPS = 1e-5  # PyTorch BatchNorm2d default eps


# --------------------------- hardware-aware configuration ---------------------------
def _hw_config():
    """VMEM-capacity-aware budgets (v5e/v6e: 128 MiB, v7x: 64 MiB per TC)."""
    cap = 64 * 1024 * 1024
    try:
        cap = int(pltpu.get_tpu_info().vmem_capacity_bytes)
    except Exception:
        pass
    if cap >= 100 * 1024 * 1024:          # v5e / v6e class (128 MiB VMEM)
        return dict(block_budget=12 * 1024 * 1024,
                    vmem_limit=96 * 1024 * 1024,
                    fused_budget=80 * 1024 * 1024)
    # v7x class (64 MiB VMEM) or unknown -> conservative
    return dict(block_budget=5 * 1024 * 1024,
                vmem_limit=48 * 1024 * 1024,
                fused_budget=36 * 1024 * 1024)


def _pick_row_tile(rows, w2, c_in, itemsize, budget_bytes):
    """Largest divisor of `rows` whose x-block (4 * tr * w2 * c_in elems) fits budget."""
    best = 1
    for t in range(1, rows + 1):
        if rows % t == 0 and 4 * t * w2 * c_in * itemsize <= budget_bytes:
            best = t
    return best


# ------------- Single-pass kernel: stats + folded BN + ReLU + pool + conv -------------
def _fused_transition_kernel(x_ref, gamma_ref, beta_ref, w_ref, o_ref, *,
                             inv_count, use_bf16_matmul):
    x = x_ref[...].astype(jnp.float32)                 # (4, R, W2, C) resident in VMEM
    # Batch statistics (single pass: var = E[x^2] - mean^2, f32 accumulators).
    s1 = x.sum(axis=0).sum(axis=0)                     # (W2, C)  major-dim adds (VPU)
    s2 = (x * x).sum(axis=0).sum(axis=0)               # (W2, C)
    mean = s1.sum(axis=0, keepdims=True) * inv_count   # (1, C)   sublane reduce
    var = s2.sum(axis=0, keepdims=True) * inv_count - mean * mean
    scale = gamma_ref[...] * jax.lax.rsqrt(var + BN_EPS)
    shift = beta_ref[...] - mean * scale
    # Folded BN affine + ReLU (2 VPU ops/elem), then 2x2 avg-pool over the major axis.
    y = jnp.maximum(x * scale + shift, 0.0)            # (4, R, W2, C)
    pooled = (y[0] + y[1] + y[2] + y[3]) * 0.25        # (R, W2, C)
    r, w2, c = pooled.shape
    lhs = pooled.reshape(r * w2, c)                    # M = R*W2 rows -> fills the MXU
    w = w_ref[...]
    if use_bf16_matmul:
        lhs = lhs.astype(jnp.bfloat16)
        w = w.astype(jnp.bfloat16)
    out = jnp.dot(lhs, w, preferred_element_type=jnp.float32)   # (R*W2, C_out)
    o_ref[...] = out.reshape(r, w2, -1).astype(o_ref.dtype)


# ---------------- Phase A (tiled path): per-block partial sums (megacore-safe) ----------------
def _bn_partial_stats_kernel(x_ref, sum_ref, sq_ref):
    x = x_ref[...].astype(jnp.float32)                 # (4, TR, W2, C)
    s1 = x.sum(axis=0).sum(axis=0)                     # (W2, C)
    s2 = (x * x).sum(axis=0).sum(axis=0)               # (W2, C)
    sum_ref[...] = s1.sum(axis=0, keepdims=True)       # (1, C) -- own output block, no race
    sq_ref[...] = s2.sum(axis=0, keepdims=True)


# ---------- Phase B (tiled path): folded BN + ReLU + 2x2 avg-pool + 1x1 conv ----------
def _bn_relu_pool_conv_kernel(x_ref, scale_ref, shift_ref, w_ref, o_ref, *,
                              use_bf16_matmul):
    x = x_ref[...].astype(jnp.float32)                 # (4, TR, W2, C)
    y = jnp.maximum(x * scale_ref[...] + shift_ref[...], 0.0)
    pooled = (y[0] + y[1] + y[2] + y[3]) * 0.25        # (TR, W2, C)
    tr, w2, c = pooled.shape
    lhs = pooled.reshape(tr * w2, c)
    w = w_ref[...]
    if use_bf16_matmul:
        lhs = lhs.astype(jnp.bfloat16)
        w = w.astype(jnp.bfloat16)
    out = jnp.dot(lhs, w, preferred_element_type=jnp.float32)   # (TR*W2, C_out)
    o_ref[...] = out.reshape(tr, w2, -1).astype(o_ref.dtype)


@functools.partial(jax.jit, static_argnames=("droprate", "single_pass",
                                             "use_bf16_matmul", "channels_last_output"))
def transition_block_forward(x, gamma, beta, conv_weight, droprate=0.0, *,
                             single_pass=None, use_bf16_matmul=False,
                             channels_last_output=False):
    """TransitionBlock forward: avg_pool2d(conv1x1(relu(bn(x))), 2).

    x:           (N, C_in, H, W)  NCHW, matching the PyTorch module.
    gamma, beta: (C_in,)          BatchNorm2d affine parameters.
    conv_weight: (C_out, C_in, 1, 1)  1x1 conv kernel (bias=False).
    Returns (N, C_out, H//2, W//2) NCHW (or (N, H//2, W//2, C_out) if
    channels_last_output=True).
    """
    if droprate > 0.0:
        # TODO(synk): dropout between the 1x1 conv and the avg-pool (dropRate > 0) is not
        # implemented in the Pallas path (module default dropRate=0.0 skips it).
        raise NotImplementedError("droprate > 0 is not supported by the Pallas path")

    n, c_in, h, w = x.shape
    c_out = conv_weight.shape[0]
    assert h % 2 == 0 and w % 2 == 0, "H and W must be even for the 2x2 avg-pool"
    h2, w2 = h // 2, w // 2
    rows = n * h2                      # all images share one row axis (bigger matmul M)
    itemsize = x.dtype.itemsize
    inv_count = 1.0 / float(n * h * w)

    cfg = _hw_config()

    # Layout plumbing: NCHW -> pool-major channels-last (4, N*H2, W2, C).
    #   x_r[2*dh+dw, n*H2+i, j, c] = x[n, c, 2*i+dh, 2*j+dw]
    # allow_input_fusion on the x operand lets XLA fuse this transpose into the kernel
    # input DMA instead of materializing x_r in HBM.
    x_r = jnp.transpose(x.reshape(n, c_in, h2, 2, w2, 2), (3, 5, 0, 2, 4, 1))
    x_r = x_r.reshape(4, rows, w2, c_in)

    gamma2 = gamma.reshape(1, c_in).astype(jnp.float32)
    beta2 = beta.reshape(1, c_in).astype(jnp.float32)
    wmat = conv_weight.reshape(c_out, c_in).T.astype(jnp.float32)   # (C_in, C_out)

    # Single-pass gate: x (input dtype) + f32 value + relu'd value + pooled/matmul temps
    # + output must fit comfortably in the scoped VMEM budget.
    x_in_bytes = 4 * rows * w2 * c_in * itemsize
    x_f32_bytes = 4 * rows * w2 * c_in * 4
    out_bytes = rows * w2 * c_out * max(4, itemsize)
    fused_footprint = x_in_bytes + 3 * x_f32_bytes + 2 * out_bytes + c_in * c_out * 4
    if single_pass is None:
        single_pass = fused_footprint <= cfg["fused_budget"]

    if single_pass:
        # ---- One kernel: x crosses HBM once; stats + apply from the same VMEM buffer ----
        out_flat = pl.pallas_call(
            functools.partial(_fused_transition_kernel, inv_count=inv_count,
                              use_bf16_matmul=use_bf16_matmul),
            out_shape=jax.ShapeDtypeStruct((rows, w2, c_out), x.dtype),
            in_specs=[pl.BlockSpec(memory_space=pltpu.MemorySpace.VMEM)] * 4,
            out_specs=pl.BlockSpec(memory_space=pltpu.MemorySpace.VMEM),
            compiler_params=pltpu.CompilerParams(
                allow_input_fusion=[True, False, False, False],
                vmem_limit_bytes=cfg["vmem_limit"]),
        )(x_r, gamma2, beta2, wmat)
    else:
        # ---- Tiled two-phase path for activations that don't fit in VMEM ----
        tr = _pick_row_tile(rows, w2, c_in, itemsize, cfg["block_budget"])
        num_blocks = rows // tr
        grid = (num_blocks,)
        x_spec = pl.BlockSpec((4, tr, w2, c_in), lambda r: (0, r, 0, 0))
        vec_spec = pl.BlockSpec((1, c_in), lambda r: (0, 0))
        w_spec = pl.BlockSpec((c_in, c_out), lambda r: (0, 0))
        part_spec = pl.BlockSpec((None, 1, c_in), lambda r: (r, 0, 0))

        # Phase A: per-block partial sums, fully parallel (megacore on v7x, no scratch race).
        part_sum, part_sq = pl.pallas_call(
            _bn_partial_stats_kernel,
            out_shape=(jax.ShapeDtypeStruct((num_blocks, 1, c_in), jnp.float32),
                       jax.ShapeDtypeStruct((num_blocks, 1, c_in), jnp.float32)),
            grid=grid,
            in_specs=[x_spec],
            out_specs=[part_spec, part_spec],
            compiler_params=pltpu.CompilerParams(
                dimension_semantics=("parallel",),
                allow_input_fusion=[True],
                vmem_limit_bytes=cfg["vmem_limit"]),
        )(x_r)

        # Tiny finalize (mean/var/rsqrt + BN fold) in plain JAX — O(C) work.
        mean = jnp.sum(part_sum, axis=(0, 1)) * inv_count
        var = jnp.sum(part_sq, axis=(0, 1)) * inv_count - mean * mean
        scale = gamma.astype(jnp.float32) * jax.lax.rsqrt(var + BN_EPS)
        shift = beta.astype(jnp.float32) - mean * scale
        scale2 = scale.reshape(1, c_in)
        shift2 = shift.reshape(1, c_in)

        # Phase B: folded BN + ReLU + pool + 1x1 conv (MXU matmul, M = tr*w2 rows).
        out_flat = pl.pallas_call(
            functools.partial(_bn_relu_pool_conv_kernel,
                              use_bf16_matmul=use_bf16_matmul),
            out_shape=jax.ShapeDtypeStruct((rows, w2, c_out), x.dtype),
            grid=grid,
            in_specs=[x_spec, vec_spec, vec_spec, w_spec],
            out_specs=pl.BlockSpec((tr, w2, c_out), lambda r: (r, 0, 0)),
            compiler_params=pltpu.CompilerParams(
                dimension_semantics=("parallel",),
                allow_input_fusion=[True, False, False, False],
                vmem_limit_bytes=cfg["vmem_limit"]),
        )(x_r, scale2, shift2, wmat)

    out_nhwc = out_flat.reshape(n, h2, w2, c_out)
    if channels_last_output:
        return out_nhwc            # skip the NCHW relayout if the consumer is channels-last
    return jnp.transpose(out_nhwc, (0, 3, 1, 2))


if __name__ == "__main__":
    key = jax.random.PRNGKey(0)
    kx, kw, kg, kb = jax.random.split(key, 4)

    # Small but lane-dense shapes (typical DenseNet transition: channel halving).
    N, C_IN, H, W = 2, 256, 16, 16
    C_OUT = 128

    x = jax.random.normal(kx, (N, C_IN, H, W), dtype=jnp.float32)
    gamma = jax.random.uniform(kg, (C_IN,), minval=0.5, maxval=1.5, dtype=jnp.float32)
    beta = 0.1 * jax.random.normal(kb, (C_IN,), dtype=jnp.float32)
    bound = 1.0 / math.sqrt(C_IN)
    conv_w = jax.random.uniform(kw, (C_OUT, C_IN, 1, 1), minval=-bound, maxval=bound,
                                dtype=jnp.float32)

    # Pure-JAX reference in the original PyTorch order (BN -> ReLU -> conv -> pool).
    mean = x.mean(axis=(0, 2, 3), keepdims=True)
    var = ((x - mean) ** 2).mean(axis=(0, 2, 3), keepdims=True)
    xbn = (x - mean) * jax.lax.rsqrt(var + BN_EPS) * gamma.reshape(1, C_IN, 1, 1) \
          + beta.reshape(1, C_IN, 1, 1)
    xr = jnp.maximum(xbn, 0.0)
    conv = jnp.einsum("nchw,oc->nohw", xr, conv_w.reshape(C_OUT, C_IN),
                      precision=jax.lax.Precision.HIGHEST)
    ref = conv.reshape(N, C_OUT, H // 2, 2, W // 2, 2).mean(axis=(3, 5))

    # Exercise BOTH paths: auto (single-pass VMEM-resident for this size) and forced tiled.
    out_fused = transition_block_forward(x, gamma, beta, conv_w)
    out_tiled = transition_block_forward(x, gamma, beta, conv_w, single_pass=False)
    jax.block_until_ready((out_fused, out_tiled))

    for name, out in (("single-pass", out_fused), ("tiled", out_tiled)):
        assert out.shape == ref.shape, (name, out.shape, ref.shape)
        max_err = float(jnp.max(jnp.abs(out - ref)))
        assert jnp.allclose(out, ref, atol=1e-2, rtol=1e-2), \
            f"{name} mismatch, max_err={max_err}"

    print("KERNEL_OK")
</pallas_src>

<mosaic_0001>
module attributes {stable_mosaic.version = 11 : i64} {
  func.func @_fused_transition_kernel(%arg0: memref<4x16x8x256xf32, #tpu.memory_space<vmem>>, %arg1: memref<1x256xf32, #tpu.memory_space<vmem>>, %arg2: memref<1x256xf32, #tpu.memory_space<vmem>>, %arg3: memref<256x128xf32, #tpu.memory_space<vmem>>, %arg4: memref<16x8x128xf32, #tpu.memory_space<vmem>>) attributes {dimension_semantics = [], scalar_prefetch = 0 : i64, scratch_operands = 0 : i64, tpu.core_type = #tpu.core_type<tc>} {
    %c0 = arith.constant 0 : index
    %c0_0 = arith.constant 0 : index
    %c0_1 = arith.constant 0 : index
    %c0_2 = arith.constant 0 : index
    %0 = vector.load %arg0[%c0, %c0_0, %c0_1, %c0_2] : memref<4x16x8x256xf32, #tpu.memory_space<vmem>>, vector<4x16x8x256xf32>
    %cst = arith.constant dense<0.000000e+00> : vector<16x8x256xf32>
    %1 = vector.multi_reduction <add>, %0, %cst [0] : vector<4x16x8x256xf32> to vector<16x8x256xf32>
    %cst_3 = arith.constant dense<0.000000e+00> : vector<8x256xf32>
    %2 = vector.multi_reduction <add>, %1, %cst_3 [0] : vector<16x8x256xf32> to vector<8x256xf32>
    %3 = arith.mulf %0, %0 : vector<4x16x8x256xf32>
    %cst_4 = arith.constant dense<0.000000e+00> : vector<16x8x256xf32>
    %4 = vector.multi_reduction <add>, %3, %cst_4 [0] : vector<4x16x8x256xf32> to vector<16x8x256xf32>
    %cst_5 = arith.constant dense<0.000000e+00> : vector<8x256xf32>
    %5 = vector.multi_reduction <add>, %4, %cst_5 [0] : vector<16x8x256xf32> to vector<8x256xf32>
    %cst_6 = arith.constant dense<0.000000e+00> : vector<256xf32>
    %6 = vector.multi_reduction <add>, %2, %cst_6 [0] : vector<8x256xf32> to vector<256xf32>
    %7 = vector.shape_cast %6 : vector<256xf32> to vector<1x256xf32>
    %cst_7 = arith.constant 0.001953125 : f32
    %8 = vector.broadcast %cst_7 : f32 to vector<1x256xf32>
    %9 = arith.mulf %7, %8 : vector<1x256xf32>
    %cst_8 = arith.constant dense<0.000000e+00> : vector<256xf32>
    %10 = vector.multi_reduction <add>, %5, %cst_8 [0] : vector<8x256xf32> to vector<256xf32>
    %11 = vector.shape_cast %10 : vector<256xf32> to vector<1x256xf32>
    %cst_9 = arith.constant 0.001953125 : f32
    %12 = vector.broadcast %cst_9 : f32 to vector<1x256xf32>
    %13 = arith.mulf %11, %12 : vector<1x256xf32>
    %14 = arith.mulf %9, %9 : vector<1x256xf32>
    %15 = arith.subf %13, %14 : vector<1x256xf32>
    %c0_10 = arith.constant 0 : index
    %c0_11 = arith.constant 0 : index
    %16 = vector.load %arg1[%c0_10, %c0_11] : memref<1x256xf32, #tpu.memory_space<vmem>>, vector<1x256xf32>
    %cst_12 = arith.constant 9.99999974E-6 : f32
    %17 = vector.broadcast %cst_12 : f32 to vector<1x256xf32>
    %18 = arith.addf %15, %17 : vector<1x256xf32>
    %19 = math.rsqrt %18 : vector<1x256xf32>
    %20 = arith.mulf %16, %19 : vector<1x256xf32>
    %c0_13 = arith.constant 0 : index
    %c0_14 = arith.constant 0 : index
    %21 = vector.load %arg2[%c0_13, %c0_14] : memref<1x256xf32, #tpu.memory_space<vmem>>, vector<1x256xf32>
    %22 = arith.mulf %9, %20 : vector<1x256xf32>
    %23 = arith.subf %21, %22 : vector<1x256xf32>
    %24 = vector.shape_cast %20 : vector<1x256xf32> to vector<1x1x1x256xf32>
    %25 = vector.broadcast %24 : vector<1x1x1x256xf32> to vector<4x16x8x256xf32>
    %26 = arith.mulf %0, %25 : vector<4x16x8x256xf32>
    %27 = vector.shape_cast %23 : vector<1x256xf32> to vector<1x1x1x256xf32>
    %28 = vector.broadcast %27 : vector<1x1x1x256xf32> to vector<4x16x8x256xf32>
    %29 = arith.addf %26, %28 : vector<4x16x8x256xf32>
    %cst_15 = arith.constant 0.000000e+00 : f32
    %30 = vector.broadcast %cst_15 : f32 to vector<4x16x8x256xf32>
    %31 = arith.maximumf %29, %30 : vector<4x16x8x256xf32>
    %32 = vector.extract_strided_slice %31 {offsets = [0, 0, 0, 0], sizes = [1, 16, 8, 256], strides = [1, 1, 1, 1]} : vector<4x16x8x256xf32> to vector<1x16x8x256xf32>
    %33 = vector.shape_cast %32 : vector<1x16x8x256xf32> to vector<16x8x256xf32>
    %34 = vector.extract_strided_slice %31 {offsets = [1, 0, 0, 0], sizes = [1, 16, 8, 256], strides = [1, 1, 1, 1]} : vector<4x16x8x256xf32> to vector<1x16x8x256xf32>
    %35 = vector.shape_cast %34 : vector<1x16x8x256xf32> to vector<16x8x256xf32>
    %36 = arith.addf %33, %35 : vector<16x8x256xf32>
    %37 = vector.extract_strided_slice %31 {offsets = [2, 0, 0, 0], sizes = [1, 16, 8, 256], strides = [1, 1, 1, 1]} : vector<4x16x8x256xf32> to vector<1x16x8x256xf32>
    %38 = vector.shape_cast %37 : vector<1x16x8x256xf32> to vector<16x8x256xf32>
    %39 = arith.addf %36, %38 : vector<16x8x256xf32>
    %40 = vector.extract_strided_slice %31 {offsets = [3, 0, 0, 0], sizes = [1, 16, 8, 256], strides = [1, 1, 1, 1]} : vector<4x16x8x256xf32> to vector<1x16x8x256xf32>
    %41 = vector.shape_cast %40 : vector<1x16x8x256xf32> to vector<16x8x256xf32>
    %42 = arith.addf %39, %41 : vector<16x8x256xf32>
    %cst_16 = arith.constant 2.500000e-01 : f32
    %43 = vector.broadcast %cst_16 : f32 to vector<16x8x256xf32>
    %44 = arith.mulf %42, %43 : vector<16x8x256xf32>
    %45 = vector.shape_cast %44 : vector<16x8x256xf32> to vector<128x256xf32>
    %c0_17 = arith.constant 0 : index
    %c0_18 = arith.constant 0 : index
    %46 = vector.load %arg3[%c0_17, %c0_18] : memref<256x128xf32, #tpu.memory_space<vmem>>, vector<256x128xf32>
    %cst_19 = arith.constant dense<0.000000e+00> : vector<128x128xf32>
    %47 = tpu.matmul %45, %46, %cst_19 {dimension_numbers = #tpu.dot_dimension_numbers<[1], [0], [0], [1], [0, 0, 1, 1], [], []>} : vector<128x256xf32>, vector<256x128xf32>, vector<128x128xf32> -> vector<128x128xf32>
    %48 = vector.shape_cast %47 : vector<128x128xf32> to vector<16x8x128xf32>
    %c0_20 = arith.constant 0 : index
    %c0_21 = arith.constant 0 : index
    %c0_22 = arith.constant 0 : index
    %49 = vector.load %arg4[%c0_20, %c0_21, %c0_22] : memref<16x8x128xf32, #tpu.memory_space<vmem>>, vector<16x8x128xf32>
    tpu.vector_store %arg4[%c0_20, %c0_21, %c0_22], %48 {strides = array<i32>} : memref<16x8x128xf32, #tpu.memory_space<vmem>>, vector<16x8x128xf32>,
    return
  }
}

</mosaic_0001>

<bundles_post_ra>
// kernel: transition_block_forward.1
= control target key start
LH: loop header
LB: loop body
LE: loop exit
PB: predicated region body
PF: predicated region fallthrough
CT: control target
= control target key end

     0   :  { %s3601_s0 = inlined_call_operand.vmem [shape: f32[4,16,8,256], index: 0, kind: input, shape index: {}]   ;;  %s3602_s1 = inlined_call_operand.vmem [shape: f32[1,256], index: 1, kind: input, shape index: {}]   ;;  %s3603_s2 = inlined_call_operand.vmem [shape: f32[1,256], index: 2, kind: input, shape index: {}]   ;;  %s3604_s3 = inlined_call_operand.vmem [shape: f32[256,128], index: 3, kind: input, shape index: {}]   ;;  %s3605_s4 = inlined_call_operand.hbm [shape: f32[16,8,128], index: 4, kind: output, shape index: {}]  }
   0x1   :  { %v1134_v0 = vld [vmem:[%s3604_s3 + $0x78] sm:$0xff]  ;;  %v1133_v2 = vld [vmem:[%s3604_s3 + $0x70] sm:$0xff]  ;;  %v1132_v4 = vld [vmem:[%s3604_s3 + $0x68] sm:$0xff] }
   0x2   :  { %v1150_v1 = vld [vmem:[%s3604_s3 + $0xf8] sm:$0xff]  ;;  %1315 = vmatpush.msra.mxu2 %v1134_v0  ;;  %v1149_v3 = vld [vmem:[%s3604_s3 + $0xf0] sm:$0xff]  ;;  %v1148_v5 = vld [vmem:[%s3604_s3 + $0xe8] sm:$0xff]  ;;  %1151 = vmatpush.msra.mxu0 %v1134_v0 }
   0x3   :  { %1331 = vmatpush.msra.mxu3 %v1150_v1  ;;  %1216 = vmatpush.msra.mxu1 %v1150_v1  ;;  %v1131_v6 = vld [vmem:[%s3604_s3 + $0x60] sm:$0xff]  ;;  %v1130_v8 = vld [vmem:[%s3604_s3 + $0x58] sm:$0xff]  ;;  %v1129_v10 = vld [vmem:[%s3604_s3 + $0x50] sm:$0xff] }
   0x4   :  { %1316 = vmatpush.msra.mxu2 %v1133_v2  ;;  %v1147_v7 = vld [vmem:[%s3604_s3 + $0xe0] sm:$0xff]  ;;  %1152 = vmatpush.msra.mxu0 %v1133_v2  ;;  %v1146_v9 = vld [vmem:[%s3604_s3 + $0xd8] sm:$0xff]  ;;  %v1145_v11 = vld [vmem:[%s3604_s3 + $0xd0] sm:$0xff] }
   0x5   :  { %1332 = vmatpush.msra.mxu3 %v1149_v3  ;;  %1217 = vmatpush.msra.mxu1 %v1149_v3  ;;  %v1128_v12 = vld [vmem:[%s3604_s3 + $0x48] sm:$0xff]  ;;  %v1127_v14 = vld [vmem:[%s3604_s3 + $0x40] sm:$0xff]  ;;  %v1126_v16 = vld [vmem:[%s3604_s3 + $0x38] sm:$0xff] }
   0x6   :  { %1317 = vmatpush.msra.mxu2 %v1132_v4  ;;  %1153 = vmatpush.msra.mxu0 %v1132_v4  ;;  %v1144_v13 = vld [vmem:[%s3604_s3 + $0xc8] sm:$0xff]  ;;  %v1143_v15 = vld [vmem:[%s3604_s3 + $0xc0] sm:$0xff]  ;;  %v1142_v17 = vld [vmem:[%s3604_s3 + $0xb8] sm:$0xff] }
   0x7   :  { %1333 = vmatpush.msra.mxu3 %v1148_v5  ;;  %1218 = vmatpush.msra.mxu1 %v1148_v5  ;;  %v1125_v18 = vld [vmem:[%s3604_s3 + $0x30] sm:$0xff]  ;;  %v1124_v20 = vld [vmem:[%s3604_s3 + $0x28] sm:$0xff]  ;;  %v1123_v22 = vld [vmem:[%s3604_s3 + $0x20] sm:$0xff] }
   0x8   :  { %1318 = vmatpush.msra.mxu2 %v1131_v6  ;;  %1154 = vmatpush.msra.mxu0 %v1131_v6  ;;  %v1141_v19 = vld [vmem:[%s3604_s3 + $0xb0] sm:$0xff]  ;;  %v1140_v21 = vld [vmem:[%s3604_s3 + $0xa8] sm:$0xff]  ;;  %v1139_v23 = vld [vmem:[%s3604_s3 + $0xa0] sm:$0xff] }
   0x9   :  { %1334 = vmatpush.msra.mxu3 %v1147_v7  ;;  %1219 = vmatpush.msra.mxu1 %v1147_v7  ;;  %v1122_v24 = vld [vmem:[%s3604_s3 + $0x18] sm:$0xff]  ;;  %v1121_v26 = vld [vmem:[%s3604_s3 + $0x10] sm:$0xff]  ;;  %v1120_v28 = vld [vmem:[%s3604_s3 + $0x8] sm:$0xff] }
   0xa   :  { %1319 = vmatpush.msra.mxu2 %v1130_v8  ;;  %1155 = vmatpush.msra.mxu0 %v1130_v8  ;;  %v1138_v25 = vld [vmem:[%s3604_s3 + $0x98] sm:$0xff]  ;;  %v1137_v27 = vld [vmem:[%s3604_s3 + $0x90] sm:$0xff]  ;;  %v1136_v29 = vld [vmem:[%s3604_s3 + $0x88] sm:$0xff] }
   0xb   :  { %1335 = vmatpush.msra.mxu3 %v1146_v9  ;;  %1220 = vmatpush.msra.mxu1 %v1146_v9  ;;  %v1119_v30 = vld [vmem:[%s3604_s3] sm:$0xff]  ;;  %v19_v33 = vld [vmem:[%s3601_s0 + $0x8] sm:$0xff]  ;;  %v20_v34 = vld [vmem:[%s3601_s0 + $0x10] sm:$0xff] }
   0xc   :  { %1320 = vmatpush.msra.mxu2 %v1129_v10  ;;  %1156 = vmatpush.msra.mxu0 %v1129_v10  ;;  %v1135_v31 = vld [vmem:[%s3604_s3 + $0x80] sm:$0xff]  ;;  %v21_v35 = vld [vmem:[%s3601_s0 + $0x18] sm:$0xff]  ;;  %v23_v37 = vld [vmem:[%s3601_s0 + $0x28] sm:$0xff]  ;;  %v1700_v57 = vmul.f32 %v19_v33, %v19_v33  ;;  %v1725_v1 = vmul.f32 %v20_v34, %v20_v34 }
   0xd   :  { %1336 = vmatpush.msra.mxu3 %v1145_v11  ;;  %1221 = vmatpush.msra.mxu1 %v1145_v11  ;;  %v18_v32 = vld [vmem:[%s3601_s0] sm:$0xff]  ;;  %v24_v39 = vld [vmem:[%s3601_s0 + $0x30] sm:$0xff]  ;;  %v1643_v40 = vld [vmem:[%s3601_s0 + $0x108] sm:$0xff]  ;;  %v1727_v2 = vmul.f32 %v21_v35, %v21_v35  ;;  %v1752_v9 = vmul.f32 %v23_v37, %v23_v37 }
   0xe   :  { %1321 = vmatpush.msra.mxu2 %v1128_v12  ;;  %1157 = vmatpush.msra.mxu0 %v1128_v12  ;;  %v22_v36 = vld [vmem:[%s3601_s0 + $0x20] sm:$0xff]  ;;  %v1648_v41 = vld [vmem:[%s3601_s0 + $0x110] sm:$0xff]  ;;  %v1653_v42 = vld [vmem:[%s3601_s0 + $0x118] sm:$0xff]  ;;  %v1680_v50 = vmul.f32 %v18_v32, %v18_v32  ;;  %v149_v54 = vadd.f32 %v1643_v40, %v19_v33  ;;  %3687 = vst [vmem:[#allocation7_spill] sm:$0xff] %v1700_v57 }
   0xf   :  { %1337 = vmatpush.msra.mxu3 %v1144_v13  ;;  %1222 = vmatpush.msra.mxu1 %v1144_v13  ;;  %v1635_v38 = vld [vmem:[%s3601_s0 + $0x100] sm:$0xff]  ;;  %v25_v43 = vld [vmem:[%s3601_s0 + $0x38] sm:$0xff]  ;;  %v1666_v45 = vld [vmem:[%s3601_s0 + $0x128] sm:$0xff]  ;;  %v152_v55 = vadd.f32 %v1648_v41, %v20_v34  ;;  %v155_v56 = vadd.f32 %v1653_v42, %v21_v35  ;;  %3691 = vst [vmem:[#allocation11_spill] sm:$0xff] %v1725_v1 }
  0x10   :  { %1322 = vmatpush.msra.mxu2 %v1127_v14  ;;  %1158 = vmatpush.msra.mxu0 %v1127_v14  ;;  %v1661_v44 = vld [vmem:[%s3601_s0 + $0x120] sm:$0xff]  ;;  %v27_v47 = vld [vmem:[%s3601_s0 + $0x48] sm:$0xff]  ;;  %v1677_v48 = vld [vmem:[%s3601_s0 + $0x130] sm:$0xff]  ;;  %v146_v49 = vadd.f32 %v1635_v38, %v18_v32  ;;  %3685 = vst [vmem:[#allocation5_spill] sm:$0xff] %v1680_v50  ;;  %v161_v0 = vadd.f32 %v1666_v45, %v23_v37 }
  0x11   :  { %1338 = vmatpush.msra.mxu3 %v1143_v15  ;;  %1223 = vmatpush.msra.mxu1 %v1143_v15  ;;  %v26_v46 = vld [vmem:[%s3601_s0 + $0x40] sm:$0xff]  ;;  %v1685_v51 = vld [vmem:[%s3601_s0 + $0x138] sm:$0xff]  ;;  %v28_v58 = vld [vmem:[%s3601_s0 + $0x50] sm:$0xff]  ;;  %v158_v63 = vadd.f32 %v1661_v44, %v22_v36  ;;  %3692 = vst [vmem:[#allocation12_spill] sm:$0xff] %v1727_v2  ;;  %v164_v7 = vadd.f32 %v1677_v48, %v24_v39 }
  0x12   :  { %1323 = vmatpush.msra.mxu2 %v1126_v16  ;;  %1159 = vmatpush.msra.mxu0 %v1126_v16  ;;  %v1690_v52 = vld [vmem:[%s3601_s0 + $0x140] sm:$0xff]  ;;  %v29_v59 = vld [vmem:[%s3601_s0 + $0x58] sm:$0xff]  ;;  %v1711_v60 = vld [vmem:[%s3601_s0 + $0x208] sm:$0xff]  ;;  %v1750_v8 = vmul.f32 %v22_v36, %v22_v36  ;;  %3696 = vst [vmem:[#allocation16_spill] sm:$0xff] %v1752_v9  ;;  %v1754_v10 = vmul.f32 %v25_v43, %v25_v43 }
  0x13   :  { %1339 = vmatpush.msra.mxu3 %v1142_v17  ;;  %1224 = vmatpush.msra.mxu1 %v1142_v17  ;;  %v1695_v53 = vld [vmem:[%s3601_s0 + $0x200] sm:$0xff]  ;;  %3688 = vst [vmem:[#allocation8_spill] sm:$0xff] %v1711_v60  ;;  %v1716_v61 = vld [vmem:[%s3601_s0 + $0x210] sm:$0xff]  ;;  %v1721_v62 = vld [vmem:[%s3601_s0 + $0x218] sm:$0xff]  ;;  %v167_v15 = vadd.f32 %v1685_v51, %v25_v43  ;;  %v1773_v16 = vmul.f32 %v24_v39, %v24_v39 }
  0x14   :  { %1324 = vmatpush.msra.mxu2 %v1125_v18  ;;  %1160 = vmatpush.msra.mxu0 %v1125_v18  ;;  %3686 = vst [vmem:[#allocation6_spill] sm:$0xff] %v1695_v53  ;;  %v1732_v3 = vld [vmem:[%s3601_s0 + $0x60] sm:$0xff]  ;;  %v1737_v4 = vld [vmem:[%s3601_s0 + $0x148] sm:$0xff]  ;;  %v1759_v11 = vld [vmem:[%s3601_s0 + $0x150] sm:$0xff]  ;;  %v147_v14 = vadd.f32 %v146_v49, %v1695_v53  ;;  %v1775_v17 = vmul.f32 %v27_v47, %v27_v47 }
  0x15   :  { %1340 = vmatpush.msra.mxu3 %v1141_v19  ;;  %1225 = vmatpush.msra.mxu1 %v1141_v19  ;;  %3689 = vst [vmem:[#allocation9_spill] sm:$0xff] %v1716_v61  ;;  %v1742_v5 = vld [vmem:[%s3601_s0 + $0x220] sm:$0xff]  ;;  %v1747_v6 = vld [vmem:[%s3601_s0 + $0x228] sm:$0xff]  ;;  %v1764_v12 = vld [vmem:[%s3601_s0 + $0x158] sm:$0xff]  ;;  %v173_v32 = vadd.f32 %v1737_v4, %v27_v47  ;;  %v1824_v33 = vmul.f32 %v26_v46, %v26_v46 }
  0x16   :  { %1325 = vmatpush.msra.mxu2 %v1124_v20  ;;  %1161 = vmatpush.msra.mxu0 %v1124_v20  ;;  %3690 = vst [vmem:[#allocation10_spill] sm:$0xff] %v1721_v62  ;;  %v1769_v13 = vld [vmem:[%s3601_s0 + $0x230] sm:$0xff]  ;;  %v1780_v18 = vld [vmem:[%s3601_s0 + $0x68] sm:$0xff]  ;;  %v1785_v19 = vld [vmem:[%s3601_s0 + $0x160] sm:$0xff]  ;;  %v1853_v47 = vmul.f32 %v28_v58, %v28_v58  ;;  %v1855_v49 = vmul.f32 %v29_v59, %v29_v59 }
  0x17   :  { %1341 = vmatpush.msra.mxu3 %v1140_v21  ;;  %1226 = vmatpush.msra.mxu1 %v1140_v21  ;;  %3693 = vst [vmem:[#allocation13_spill] sm:$0xff] %v1742_v5  ;;  %v1790_v20 = vld [vmem:[%s3601_s0 + $0x168] sm:$0xff]  ;;  %v1795_v21 = vld [vmem:[%s3601_s0 + $0x238] sm:$0xff]  ;;  %v1839_v36 = vld [vmem:[%s3601_s0 + $0x250] sm:$0xff]  ;;  %v165_v43 = vadd.f32 %v164_v7, %v1769_v13  ;;  %v182_v7 = vadd.f32 %v1785_v19, %v1732_v3 }
  0x18   :  { %1326 = vmatpush.msra.mxu2 %v1123_v22  ;;  %1162 = vmatpush.msra.mxu0 %v1123_v22  ;;  %3694 = vst [vmem:[#allocation14_spill] sm:$0xff] %v1747_v6  ;;  %v150_v22 = vadd.f32 %v149_v54, %v1711_v60  ;;  %v1829_v34 = vld [vmem:[%s3601_s0 + $0x78] sm:$0xff]  ;;  %v1849_v39 = vld [vmem:[%s3601_s0 + $0x300] sm:$0xff]  ;;  %v1860_v54 = vld [vmem:[%s3601_s0 + $0x308] sm:$0xff]  ;;  %v185_v2 = vadd.f32 %v1790_v20, %v1780_v18 }
  0x19   :  { %1342 = vmatpush.msra.mxu3 %v1139_v23  ;;  %1227 = vmatpush.msra.mxu1 %v1139_v23  ;;  %3695 = vst [vmem:[#allocation15_spill] sm:$0xff] %v1750_v8  ;;  %v153_v23 = vadd.f32 %v152_v55, %v1716_v61  ;;  %v1834_v35 = vld [vmem:[%s3601_s0 + $0x178] sm:$0xff]  ;;  %v1865_v55 = vld [vmem:[%s3601_s0 + $0x310] sm:$0xff]  ;;  %v1909_v9 = vld [vmem:[%s3601_s0 + $0x260] sm:$0xff] }
  0x1a   :  { %1327 = vmatpush.msra.mxu2 %v1122_v24  ;;  %1163 = vmatpush.msra.mxu0 %v1122_v24  ;;  %3697 = vst [vmem:[#allocation17_spill] sm:$0xff] %v1754_v10  ;;  %v156_v24 = vadd.f32 %v155_v56, %v1721_v62  ;;  %v1844_v37 = vld [vmem:[%s3601_s0 + $0x258] sm:$0xff]  ;;  %v1929_v57 = vld [vmem:[%s3601_s0 + $0x180] sm:$0xff]  ;;  %v1934_v1 = vld [vmem:[%s3601_s0 + $0x268] sm:$0xff] }
  0x1b   :  { %1343 = vmatpush.msra.mxu3 %v1138_v25  ;;  %1228 = vmatpush.msra.mxu1 %v1138_v25  ;;  %3698 = vst [vmem:[#allocation18_spill] sm:$0xff] %v1769_v13  ;;  %v170_v25 = vadd.f32 %v1690_v52, %v26_v46  ;;  %v176_v46 = vadd.f32 %v1759_v11, %v28_v58  ;;  %v1870_v56 = vld [vmem:[%s3601_s0 + $0x318] sm:$0xff] }
  0x1c   :  { %1328 = vmatpush.msra.mxu2 %v1121_v26  ;;  %1164 = vmatpush.msra.mxu0 %v1121_v26  ;;  %3699 = vst [vmem:[#allocation19_spill] sm:$0xff] %v1773_v16  ;;  %v1804_v26 = vld [vmem:[%s3601_s0 + $0x70] sm:$0xff]  ;;  %v148_v58 = vadd.f32 %v147_v14, %v1849_v39  ;;  %v1890_v14 = vld [vmem:[%s3601_s0 + $0x328] sm:$0xff] }
  0x1d   :  { %1344 = vmatpush.msra.mxu3 %v1137_v27  ;;  %1229 = vmatpush.msra.mxu1 %v1137_v27  ;;  %3700 = vst [vmem:[#allocation20_spill] sm:$0xff] %v1775_v17  ;;  %v1809_v27 = vld [vmem:[%s3601_s0 + $0x170] sm:$0xff]  ;;  %v154_v17 = vadd.f32 %v153_v23, %v1865_v55  ;;  %v1904_v16 = vld [vmem:[%s3601_s0 + $0x88] sm:$0xff]  ;;  %v1919_v23 = vld [vmem:[%s3601_s0 + $0x340] sm:$0xff] }
  0x1e   :  { %1329 = vmatpush.msra.mxu2 %v1120_v28  ;;  %1165 = vmatpush.msra.mxu0 %v1120_v28  ;;  %3701 = vst [vmem:[#allocation21_spill] sm:$0xff] %v1795_v21  ;;  %v1814_v28 = vld [vmem:[%s3601_s0 + $0x240] sm:$0xff]  ;;  %v188_v50 = vadd.f32 %v1809_v27, %v1804_v26 }
  0x1f   :  { %1345 = vmatpush.msra.mxu3 %v1136_v29  ;;  %1230 = vmatpush.msra.mxu1 %v1136_v29  ;;  %3702 = vst [vmem:[#allocation22_spill] sm:$0xff] %v1814_v28  ;;  %v1819_v29 = vld [vmem:[%s3601_s0 + $0x248] sm:$0xff]  ;;  %v171_v10 = vadd.f32 %v170_v25, %v1814_v28  ;;  %v2062_v28 = vld [vmem:[%s3601_s0 + $0xc0] sm:$0xff] }
  0x20   :  { %1330 = vmatpush.msra.mxu2 %v1119_v30  ;;  %1166 = vmatpush.msra.mxu0 %v1119_v30  ;;  %3703 = vst [vmem:[#allocation23_spill] sm:$0xff] %v1819_v29  ;;  %v159_v30 = vadd.f32 %v158_v63, %v1742_v5  ;;  %v168_v63 = vadd.f32 %v167_v15, %v1795_v21  ;;  %v2067_v21 = vld [vmem:[%s3601_s0 + $0x1a0] sm:$0xff] }
  0x21   :  { %1346 = vmatpush.msra.mxu3 %v1135_v31  ;;  %1231 = vmatpush.msra.mxu1 %v1135_v31  ;;  %v162_v31 = vadd.f32 %v161_v0, %v1747_v6  ;;  %3704 = vst [vmem:[#allocation24_spill] sm:$0xff] %v1824_v33  ;;  %v179_v0 = vadd.f32 %v1764_v12, %v29_v59  ;;  %v1895_v59 = vld [vmem:[%s3601_s0 + $0x330] sm:$0xff] }
  0x22   :  { %3705 = vst [vmem:[#allocation25_spill] sm:$0xff] %v1839_v36  ;;  %v151_v15 = vadd.f32 %v150_v22, %v1860_v54  ;;  %v157_v33 = vadd.f32 %v156_v24, %v1870_v56  ;;  %v1914_v22 = vld [vmem:[%s3601_s0 + $0x338] sm:$0xff]  ;;  %v174_v8 = vadd.f32 %v173_v32, %v1819_v29  ;;  %v177_v32 = vadd.f32 %v176_v46, %v1839_v36 }
  0x23   :  { %3706 = vst [vmem:[#allocation26_spill] sm:$0xff] %v1844_v37  ;;  %v163_v25 = vadd.f32 %v162_v31, %v1890_v14  ;;  %v166_v31 = vadd.f32 %v165_v43, %v1895_v59  ;;  %v1958_v43 = vld [vmem:[%s3601_s0 + $0x350] sm:$0xff]  ;;  %v169_v46 = vadd.f32 %v168_v63, %v1914_v22  ;;  %v183_v63 = vadd.f32 %v182_v7, %v1909_v9 }
  0x24   :  { %3707 = vst [vmem:[#allocation27_spill] sm:$0xff] %v1849_v39  ;;  %v172_v39 = vadd.f32 %v171_v10, %v1919_v23  ;;  %v1993_v10 = vld [vmem:[%s3601_s0 + $0x360] sm:$0xff]  ;;  %v2057_v29 = vmul.f32 %v1732_v3, %v1732_v3  ;;  %v2077_v3 = vld [vmem:[%s3601_s0 + $0x378] sm:$0xff] }
  0x25   :  { %3708 = vst [vmem:[#allocation28_spill] sm:$0xff] %v1853_v47  ;;  %v1885_v47 = vld [vmem:[%s3601_s0 + $0x320] sm:$0xff] }
  0x26   :  { %3709 = vst [vmem:[#allocation29_spill] sm:$0xff] %v1855_v49  ;;  %v1880_v49 = vld [vmem:[%s3601_s0 + $0x80] sm:$0xff]  ;;  %v160_v24 = vadd.f32 %v159_v30, %v1885_v47  ;;  %v1939_v30 = vld [vmem:[%s3601_s0 + $0x348] sm:$0xff] }
  0x27   :  { %3710 = vst [vmem:[#allocation30_spill] sm:$0xff] %v1860_v54  ;;  %v1972_v54 = vld [vmem:[%s3601_s0 + $0x358] sm:$0xff]  ;;  %v175_v7 = vadd.f32 %v174_v8, %v1939_v30  ;;  %v2012_v8 = vld [vmem:[%s3601_s0 + $0x280] sm:$0xff] }
  0x28   :  { %3711 = vst [vmem:[#allocation31_spill] sm:$0xff] %v1865_v55  ;;  %v1967_v55 = vld [vmem:[%s3601_s0 + $0x278] sm:$0xff] }
  0x29   :  { %3712 = vst [vmem:[#allocation32_spill] sm:$0xff] %v1870_v56  ;;  %v1953_v56 = vld [vmem:[%s3601_s0 + $0x270] sm:$0xff] }
  0x2a   :  { %3713 = vst [vmem:[#allocation33_spill] sm:$0xff] %v1880_v49 }
  0x2b   :  { %3714 = vst [vmem:[#allocation34_spill] sm:$0xff] %v1885_v47  ;;  %v1948_v47 = vld [vmem:[%s3601_s0 + $0x188] sm:$0xff] }
  0x2c   :  { %3715 = vst [vmem:[#allocation35_spill] sm:$0xff] %v1890_v14  ;;  %v242_v14 = vadd.f32 %v154_v17, %v148_v58  ;;  %v191_v17 = vadd.f32 %v1834_v35, %v1829_v34  ;;  %v257_v58 = vadd.f32 %v157_v33, %v151_v15  ;;  %v1983_v33 = vld [vmem:[%s3601_s0 + $0x90] sm:$0xff]  ;;  %v1988_v15 = vld [vmem:[%s3601_s0 + $0x98] sm:$0xff] }
  0x2d   :  { %3716 = vst [vmem:[#allocation36_spill] sm:$0xff] %v1895_v59  ;;  %v180_v59 = vadd.f32 %v179_v0, %v1844_v37  ;;  %v1978_v0 = vmul.f32 %v1780_v18, %v1780_v18  ;;  %v186_v18 = vadd.f32 %v185_v2, %v1934_v1  ;;  %v2017_v2 = vld [vmem:[%s3601_s0 + $0x368] sm:$0xff]  ;;  %v2031_v37 = vld [vmem:[%s3601_s0 + $0xb0] sm:$0xff] }
  0x2e   :  { %3717 = vst [vmem:[#allocation37_spill] sm:$0xff] %v1904_v16 }
  0x2f   :  { %3718 = vst [vmem:[#allocation38_spill] sm:$0xff] %v1909_v9  ;;  %v2026_v9 = vld [vmem:[%s3601_s0 + $0xa8] sm:$0xff] }
  0x30   :  { %3719 = vst [vmem:[#allocation39_spill] sm:$0xff] %v1914_v22  ;;  %v243_v22 = vadd.f32 %v242_v14, %v160_v24  ;;  %v194_v14 = vadd.f32 %v1929_v57, %v1880_v49  ;;  %v258_v24 = vadd.f32 %v257_v58, %v163_v25  ;;  %v178_v25 = vadd.f32 %v177_v32, %v1958_v43  ;;  %v2036_v32 = vld [vmem:[%s3601_s0 + $0xb8] sm:$0xff] }
  0x31   :  { %3720 = vst [vmem:[#allocation40_spill] sm:$0xff] %v1919_v23  ;;  %v2007_v23 = vld [vmem:[%s3601_s0 + $0x190] sm:$0xff]  ;;  %v189_v58 = vadd.f32 %v188_v50, %v1953_v56  ;;  %v2041_v50 = vld [vmem:[%s3601_s0 + $0x198] sm:$0xff] }
  0x32   :  { %3721 = vst [vmem:[#allocation41_spill] sm:$0xff] %v1929_v57  ;;  %v259_v36 = vadd.f32 %v258_v24, %v169_v46  ;;  %v184_v46 = vadd.f32 %v183_v63, %v1993_v10  ;;  %v2082_v24 = vmul.f32 %v1829_v34, %v1829_v34  ;;  %v187_v34 = vadd.f32 %v186_v18, %v2017_v2 }
  0x33   :  { %3722 = vst [vmem:[#allocation42_spill] sm:$0xff] %v1934_v1  ;;  %v244_v1 = vadd.f32 %v243_v22, %v166_v31  ;;  %v2046_v22 = vld [vmem:[%s3601_s0 + $0x288] sm:$0xff]  ;;  %v2051_v31 = vld [vmem:[%s3601_s0 + $0x370] sm:$0xff] }
  0x34   :  { %3723 = vst [vmem:[#allocation43_spill] sm:$0xff] %v1939_v30  ;;  %v197_v30 = vadd.f32 %v1948_v47, %v1904_v16  ;;  %v260_v63 = vadd.f32 %v259_v36, %v175_v7 }
  0x35   :  { %3724 = vst [vmem:[#allocation44_spill] sm:$0xff] %v1948_v47 }
  0x36   :  { %3725 = vst [vmem:[#allocation45_spill] sm:$0xff] %v1953_v56  ;;  %v192_v56 = vadd.f32 %v191_v17, %v1967_v55  ;;  %v245_v17 = vadd.f32 %v244_v1, %v172_v39  ;;  %v2101_v1 = vld [vmem:[%s3601_s0 + $0x1b8] sm:$0xff]  ;;  %v200_v39 = vadd.f32 %v2007_v23, %v1983_v33 }
  0x37   :  { %3726 = vst [vmem:[#allocation46_spill] sm:$0xff] %v1958_v43  ;;  %v181_v43 = vadd.f32 %v180_v59, %v1972_v54  ;;  %v2072_v59 = vld [vmem:[%s3601_s0 + $0x1a8] sm:$0xff] }
  0x38   :  { %3727 = vst [vmem:[#allocation47_spill] sm:$0xff] %v1967_v55  ;;  %v2096_v55 = vld [vmem:[%s3601_s0 + $0x1b0] sm:$0xff] }
  0x39   :  { %3728 = vst [vmem:[#allocation48_spill] sm:$0xff] %v1972_v54  ;;  %v2091_v54 = vld [vmem:[%s3601_s0 + $0xc8] sm:$0xff] }
  0x3a   :  { %3729 = vst [vmem:[#allocation49_spill] sm:$0xff] %v1978_v0  ;;  %v2002_v0 = vld [vmem:[%s3601_s0 + $0xa0] sm:$0xff] }
  0x3b   :  { %3730 = vst [vmem:[#allocation50_spill] sm:$0xff] %v1983_v33 }
  0x3c   :  { %3731 = vst [vmem:[#allocation51_spill] sm:$0xff] %v1988_v15 }
  0x3d   :  { %3732 = vst [vmem:[#allocation52_spill] sm:$0xff] %v1993_v10 }
  0x3e   :  { %3733 = vst [vmem:[#allocation53_spill] sm:$0xff] %v2007_v23 }
  0x3f   :  { %3734 = vst [vmem:[#allocation54_spill] sm:$0xff] %v2012_v8 }
  0x40   :  { %3735 = vst [vmem:[#allocation55_spill] sm:$0xff] %v2017_v2 }
  0x41   :  { %3736 = vst [vmem:[#allocation56_spill] sm:$0xff] %v2041_v50 }
  0x42   :  { %3737 = vst [vmem:[#allocation57_spill] sm:$0xff] %v2046_v22 }
  0x43   :  { %3738 = vst [vmem:[#allocation58_spill] sm:$0xff] %v2051_v31 }
  0x44   :  { %3739 = vst [vmem:[#allocation59_spill] sm:$0xff] %v2057_v29  ;;  %v2086_v29 = vmul.f32 %v1635_v38, %v1635_v38  ;;  %v195_v38 = vadd.f32 %v194_v14, %v2012_v8 }
  0x45   :  { %3740 = vst [vmem:[#allocation60_spill] sm:$0xff] %v2067_v21 }
  0x46   :  { %3741 = vst [vmem:[#allocation61_spill] sm:$0xff] %v2072_v59 }
  0x47   :  { %3742 = vst [vmem:[#allocation62_spill] sm:$0xff] %v2077_v3 }
  0x48   :  { %3743 = vst [vmem:[#allocation63_spill] sm:$0xff] %v2082_v24 }
  0x49   :  { %3744 = vst [vmem:[#allocation64_spill] sm:$0xff] %v2086_v29 }
  0x4a   :  { %3745 = vst [vmem:[#allocation65_spill] sm:$0xff] %v2096_v55 }
  0x4b   :  { %3746 = vst [vmem:[#allocation66_spill] sm:$0xff] %v2101_v1 }
  0x4c   :  { %9 = vsyncpa [#allocation3], 0  ;;  %v2110_v24 = vld [vmem:[%s3601_s0 + $0xd0] sm:$0xff]  ;;  %v2115_v10 = vld [vmem:[%s3601_s0 + $0xd8] sm:$0xff]  ;;  %v190_v14 = vadd.f32 %v189_v58, %v2051_v31  ;;  %v198_v2 = vadd.f32 %v197_v30, %v2046_v22  ;;  %v203_v29 = vadd.f32 %v2041_v50, %v1988_v15  ;;  %v246_v8 = vadd.f32 %v245_v17, %v178_v25  ;;  %s1303_s8 = sshll.u32 %s3605_s4, 4  ;;  %s1491_s9 = smov 128   ;;  %s1304_s8 = int_to_ptr.hbm [resolvable:$true] %s1303_s8 }
  0x4d   :  { %v2120_v18 = vld [vmem:[%s3601_s0 + $0x1c0] sm:$0xff]  ;;  %v2125_v36 = vld [vmem:[%s3601_s0 + $0x290] sm:$0xff]  ;;  %v2144_v6 = vld [vmem:[%s3601_s0 + $0xe8] sm:$0xff]  ;;  %v193_v22 = vadd.f32 %v192_v56, %v2077_v3  ;;  %v206_v5 = vadd.f32 %v2067_v21, %v2002_v0  ;;  %v261_v62 = vadd.f32 %v260_v63, %v181_v43  ;;  %v2176_v61 = vmul.f32 %v1804_v26, %v1804_v26  ;;  %s1492_s10 = smov 8  }
  0x4e   :  { %3747 = vst [vmem:[#allocation67_spill] sm:$0xff] %v2125_v36  ;;  %v2130_v7 = vld [vmem:[%s3601_s0 + $0x380] sm:$0xff]  ;;  %v2149_v58 = vld [vmem:[%s3601_s0 + $0xf0] sm:$0xff]  ;;  %v2154_v30 = vld [vmem:[%s3601_s0 + $0xf8] sm:$0xff]  ;;  %v209_v43 = vadd.f32 %v2072_v59, %v2026_v9  ;;  %v212_v26 = vadd.f32 %v2096_v55, %v2031_v37  ;;  %v215_v63 = vadd.f32 %v2101_v1, %v2036_v32  ;;  %v201_v1 = vadd.f32 %v200_v39, %v2125_v36 }
  0x4f   :  { %3748 = vst [vmem:[#allocation68_spill] sm:$0xff] %v2130_v7  ;;  %v2139_v13 = vld [vmem:[%s3601_s0 + $0xe0] sm:$0xff]  ;;  %v2159_v25 = vld [vmem:[%s3601_s0 + $0x1c8] sm:$0xff]  ;;  %v2164_v17 = vld [vmem:[%s3601_s0 + $0x298] sm:$0xff]  ;;  %v196_v55 = vadd.f32 %v195_v38, %v2130_v7  ;;  %vm584_vm6 = vcmask 1040384  }
  0x50   :  { %3749 = vst [vmem:[#allocation69_spill] sm:$0xff] %v2164_v17  ;;  %v2169_v31 = vld [vmem:[%s3601_s0 + $0x388] sm:$0xff]  ;;  %v2181_v60 = vld [vmem:[%s3601_s0 + $0x1d0] sm:$0xff]  ;;  %v2186_v53 = vld [vmem:[%s3601_s0 + $0x1d8] sm:$0xff]  ;;  %v204_v38 = vadd.f32 %v203_v29, %v2164_v17  ;;  %v221_v39 = vadd.f32 %v2159_v25, %v2091_v54 }
  0x51   :  { %3750 = vst [vmem:[#allocation70_spill] sm:$0xff] %v2169_v31  ;;  %v2191_v56 = vld [vmem:[%s3601_s0 + $0x1e0] sm:$0xff]  ;;  %v2202_v3 = vld [vmem:[%s3601_s0 + $0x1e8] sm:$0xff]  ;;  %v2207_v21 = vld [vmem:[%s3601_s0 + $0x1f0] sm:$0xff]  ;;  %v199_v47 = vadd.f32 %v198_v2, %v2169_v31  ;;  %v224_v36 = vadd.f32 %v2181_v60, %v2110_v24  ;;  %v227_v29 = vadd.f32 %v2186_v53, %v2115_v10 }
  0x52   :  { %3751 = vst [vmem:[#allocation71_spill] sm:$0xff] %v2176_v61  ;;  %v247_v61 = vadd.f32 %v246_v8, %v184_v46  ;;  %v2212_v59 = vld [vmem:[%s3601_s0 + $0x1f8] sm:$0xff]  ;;  %v218_v8 = vadd.f32 %v2120_v18, %v2062_v28  ;;  %v262_v46 = vadd.f32 %v261_v62, %v187_v34  ;;  %v2221_v50 = vld [vmem:[%s3601_s0 + $0x2a0] sm:$0xff]  ;;  %v2226_v23 = vld [vmem:[%s3601_s0 + $0x390] sm:$0xff]  ;;  %v233_v31 = vadd.f32 %v2202_v3, %v2144_v6 }
  0x53   :  { %3752 = vst [vmem:[#allocation72_spill] sm:$0xff] %v2181_v60  ;;  %v2235_v62 = vld [vmem:[%s3601_s0 + $0x2a8] sm:$0xff]  ;;  %v2240_v34 = vld [vmem:[%s3601_s0 + $0x398] sm:$0xff]  ;;  %v236_v17 = vadd.f32 %v2207_v21, %v2149_v58  ;;  %v239_v60 = vadd.f32 %v2212_v59, %v2154_v30 }
  0x54   :  { %3753 = vst [vmem:[#allocation73_spill] sm:$0xff] %v2186_v53  ;;  %v248_v7 = vadd.f32 %v247_v61, %v190_v14  ;;  %v263_v2 = vadd.f32 %v262_v46, %v193_v22  ;;  %v2248_v61 = vmul.f32 %v1880_v49, %v1880_v49  ;;  %v230_v14 = vadd.f32 %v2191_v56, %v2139_v13  ;;  %v2261_v22 = vld [vmem:[%s3601_s0 + $0x2b0] sm:$0xff]  ;;  %v2266_v46 = vld [vmem:[%s3601_s0 + $0x2b8] sm:$0xff] }
  0x55   :  { %3754 = vst [vmem:[#allocation74_spill] sm:$0xff] %v2191_v56  ;;  %v202_v49 = vadd.f32 %v201_v1, %v2226_v23  ;;  %v2282_v56 = vld [vmem:[%s3601_s0 + $0x3a0] sm:$0xff]  ;;  %v205_v53 = vadd.f32 %v204_v38, %v2240_v34  ;;  %v210_v1 = vadd.f32 %v209_v43, %v2235_v62  ;;  %v2303_v38 = vld [vmem:[%s3601_s0 + $0x3a8] sm:$0xff]  ;;  %v2311_v43 = vmul.f32 %v2002_v0, %v2002_v0 }
  0x56   :  { %3755 = vst [vmem:[#allocation75_spill] sm:$0xff] %v2202_v3  ;;  %v249_v3 = vadd.f32 %v248_v7, %v196_v55  ;;  %v2288_v55 = vmul.f32 %v1983_v33, %v1983_v33  ;;  %v2293_v7 = vld [vmem:[%s3601_s0 + $0x2c8] sm:$0xff]  ;;  %v2319_v33 = vmul.f32 %v2031_v37, %v2031_v37  ;;  %v216_v37 = vadd.f32 %v215_v63, %v2266_v46 }
  0x57   :  { %3756 = vst [vmem:[#allocation76_spill] sm:$0xff] %v2207_v21  ;;  %v2272_v21 = vmul.f32 %v1904_v16, %v1904_v16  ;;  %v2298_v16 = vld [vmem:[%s3601_s0 + $0x2d0] sm:$0xff]  ;;  %v2334_v0 = vld [vmem:[%s3601_s0 + $0x2e8] sm:$0xff] }
  0x58   :  { %3757 = vst [vmem:[#allocation77_spill] sm:$0xff] %v2212_v59  ;;  %v2277_v59 = vld [vmem:[%s3601_s0 + $0x2c0] sm:$0xff] }
  0x59   :  { %3758 = vst [vmem:[#allocation78_spill] sm:$0xff] %v2226_v23  ;;  %v219_v63 = vadd.f32 %v218_v8, %v2277_v59  ;;  %v2383_v8 = vld [vmem:[%s3601_s0 + $0x3c8] sm:$0xff] }
  0x5a   :  { %3759 = vst [vmem:[#allocation79_spill] sm:$0xff] %v2240_v34  ;;  %v2430_v34 = vld [vmem:[%s3601_s0 + $0x3f8] sm:$0xff] }
  0x5b   :  { %3760 = vst [vmem:[#allocation80_spill] sm:$0xff] %v2248_v61  ;;  %v207_v61 = vadd.f32 %v206_v5, %v2221_v50  ;;  %v264_v5 = vadd.f32 %v263_v2, %v199_v47  ;;  %v2307_v47 = vmul.f32 %v1988_v15, %v1988_v15  ;;  %v2315_v2 = vmul.f32 %v2026_v9, %v2026_v9  ;;  %v2329_v15 = vld [vmem:[%s3601_s0 + $0x2e0] sm:$0xff] }
  0x5c   :  { %3761 = vst [vmem:[#allocation81_spill] sm:$0xff] %v2272_v21  ;;  %v213_v9 = vadd.f32 %v212_v26, %v2261_v22  ;;  %v211_v21 = vadd.f32 %v210_v1, %v2303_v38  ;;  %v2395_v1 = vmul.f32 %v2110_v24, %v2110_v24 }
  0x5d   :  { %3762 = vst [vmem:[#allocation82_spill] sm:$0xff] %v2282_v56  ;;  %v208_v26 = vadd.f32 %v207_v61, %v2282_v56  ;;  %v222_v61 = vadd.f32 %v221_v39, %v2293_v7  ;;  %v2425_v56 = vld [vmem:[%s3601_s0 + $0x3f0] sm:$0xff] }
  0x5e   :  { %3763 = vst [vmem:[#allocation83_spill] sm:$0xff] %v2288_v55  ;;  %v2324_v55 = vld [vmem:[%s3601_s0 + $0x2d8] sm:$0xff] }
  0x5f   :  { %3764 = vst [vmem:[#allocation84_spill] sm:$0xff] %v2303_v38  ;;  %v228_v39 = vadd.f32 %v227_v29, %v2324_v55  ;;  %v2405_v38 = vld [vmem:[%s3601_s0 + $0x3e0] sm:$0xff]  ;;  %v2410_v29 = vld [vmem:[%s3601_s0 + $0x3e8] sm:$0xff]  ;;  %v223_v23 = vadd.f32 %v222_v61, %v2383_v8  ;;  %v2464_v61 = vmul.f32 %v1648_v41, %v1648_v41  ;;  %v2484_v41 = vmul.f32 %v1685_v51, %v1685_v51 }
  0x60   :  { %3765 = vst [vmem:[#allocation85_spill] sm:$0xff] %v2307_v47  ;;  %v2354_v47 = vld [vmem:[%s3601_s0 + $0x2f8] sm:$0xff]  ;;  %v2504_v51 = vmul.f32 %v1785_v19, %v1785_v19 }
  0x61   :  { %3766 = vst [vmem:[#allocation86_spill] sm:$0xff] %v2311_v43  ;;  %v2349_v43 = vld [vmem:[%s3601_s0 + $0x2f0] sm:$0xff]  ;;  %v240_v24 = vadd.f32 %v239_v60, %v2354_v47 }
  0x62   :  { %3767 = vst [vmem:[#allocation87_spill] sm:$0xff] %v2315_v2  ;;  %v2344_v2 = vmul.f32 %v2062_v28, %v2062_v28  ;;  %v2365_v28 = vld [vmem:[%s3601_s0 + $0x3b0] sm:$0xff] }
  0x63   :  { %3768 = vst [vmem:[#allocation88_spill] sm:$0xff] %v2319_v33  ;;  %v2340_v33 = vmul.f32 %v2036_v32, %v2036_v32  ;;  %v250_v32 = vadd.f32 %v249_v3, %v202_v49  ;;  %v225_v49 = vadd.f32 %v224_v36, %v2298_v16  ;;  %v265_v3 = vadd.f32 %v264_v5, %v205_v53  ;;  %v2400_v5 = vld [vmem:[%s3601_s0 + $0x3d8] sm:$0xff] }
  0x64   :  { %3770 = vst [vmem:[#allocation90_spill] sm:$0xff] %v2344_v2  ;;  %v2370_v2 = vld [vmem:[%s3601_s0 + $0x3b8] sm:$0xff]  ;;  %v231_v36 = vadd.f32 %v230_v14, %v2329_v15  ;;  %v234_v53 = vadd.f32 %v233_v31, %v2334_v0  ;;  %v237_v31 = vadd.f32 %v236_v17, %v2349_v43  ;;  %v2416_v14 = vmul.f32 %v2115_v10, %v2115_v10 }
  0x65   :  { %3769 = vst [vmem:[#allocation89_spill] sm:$0xff] %v2340_v33  ;;  %v2360_v33 = vmul.f32 %v2091_v54, %v2091_v54  ;;  %v2378_v54 = vld [vmem:[%s3601_s0 + $0x3c0] sm:$0xff]  ;;  %v214_v60 = vadd.f32 %v213_v9, %v2365_v28  ;;  %v251_v17 = vadd.f32 %v250_v32, %v208_v26  ;;  %v2435_v10 = vmul.f32 %v2144_v6, %v2144_v6 }
  0x66   :  { %3771 = vst [vmem:[#allocation91_spill] sm:$0xff] %v2349_v43  ;;  %v229_v9 = vadd.f32 %v228_v39, %v2400_v5  ;;  %v232_v26 = vadd.f32 %v231_v36, %v2405_v38  ;;  %v235_v6 = vadd.f32 %v234_v53, %v2410_v29  ;;  %v2449_v32 = vadd.f32 %v237_v31, %v2425_v56  ;;  %v3783_v36 = vld [vmem:[#allocation44_spill] sm:$0xff]  ;;  %v3785_v53 = vld [vmem:[#allocation53_spill] sm:$0xff] }
  0x67   :  { %3772 = vst [vmem:[#allocation92_spill] sm:$0xff] %v2354_v47  ;;  %v266_v47 = vadd.f32 %v265_v3, %v211_v21  ;;  %v2460_v21 = vmul.f32 %v1643_v40, %v1643_v40  ;;  %v2472_v3 = vmul.f32 %v1661_v44, %v1661_v44  ;;  %v2480_v40 = vmul.f32 %v1677_v48, %v1677_v48 }
  0x68   :  { %3773 = vst [vmem:[#allocation93_spill] sm:$0xff] %v2360_v33  ;;  %v2388_v33 = vld [vmem:[%s3601_s0 + $0x3d0] sm:$0xff]  ;;  %v2492_v44 = vmul.f32 %v1737_v4, %v1737_v4  ;;  %v2500_v48 = vmul.f32 %v1764_v12, %v1764_v12  ;;  %v2512_v4 = vmul.f32 %v1809_v27, %v1809_v27  ;;  %v2520_v12 = vmul.f32 %v1929_v57, %v1929_v57  ;;  %v3787_v27 = vld [vmem:[#allocation56_spill] sm:$0xff]  ;;  %v3803_v57 = vld [vmem:[#allocation74_spill] sm:$0xff] }
  0x69   :  { %3774 = vst [vmem:[#allocation94_spill] sm:$0xff] %v2395_v1  ;;  %v2420_v1 = vmul.f32 %v2139_v13, %v2139_v13  ;;  %v2439_v13 = vmul.f32 %v2149_v58, %v2149_v58  ;;  %v226_v43 = vadd.f32 %v225_v49, %v2388_v33  ;;  %v2452_v58 = vadd.f32 %v240_v24, %v2430_v34 }
  0x6a   :  { %3775 = vst [vmem:[#allocation95_spill] sm:$0xff] %v2416_v14  ;;  %v220_v14 = vadd.f32 %v219_v63, %v2378_v54  ;;  %v252_v63 = vadd.f32 %v251_v17, %v214_v60  ;;  %v2468_v49 = vmul.f32 %v1653_v42, %v1653_v42  ;;  %v2488_v42 = vmul.f32 %v1690_v52, %v1690_v52  ;;  %v3793_v17 = vld [vmem:[#allocation65_spill] sm:$0xff] }
  0x6b   :  { %3776 = vst [vmem:[#allocation96_spill] sm:$0xff] %v2420_v1  ;;  %v217_v1 = vadd.f32 %v216_v37, %v2370_v2  ;;  %v2456_v37 = vmul.f32 %v2154_v30, %v2154_v30  ;;  %v2476_v30 = vmul.f32 %v1666_v45, %v1666_v45  ;;  %v2496_v45 = vmul.f32 %v1759_v11, %v1759_v11 }
  0x6c   :  { %3777 = vst [vmem:[#allocation97_spill] sm:$0xff] %v2425_v56  ;;  %v2508_v52 = vmul.f32 %v1790_v20, %v1790_v20  ;;  %v2516_v11 = vmul.f32 %v1834_v35, %v1834_v35  ;;  %v2524_v19 = vmul.f32 %v3783_v36, %v3783_v36  ;;  %v2528_v20 = vmul.f32 %v3785_v53, %v3785_v53  ;;  %v3789_v35 = vld [vmem:[#allocation60_spill] sm:$0xff]  ;;  %v3795_v36 = vld [vmem:[#allocation66_spill] sm:$0xff] }
  0x6d   :  { %3778 = vst [vmem:[#allocation98_spill] sm:$0xff] %v2430_v34  ;;  %v267_v39 = vadd.f32 %v266_v47, %v217_v1  ;;  %v253_v47 = vadd.f32 %v252_v63, %v220_v14  ;;  %v2532_v31 = vmul.f32 %v3787_v27, %v3787_v27  ;;  %v2536_v24 = vmul.f32 %v3789_v35, %v3789_v35  ;;  %v3791_v14 = vld [vmem:[#allocation61_spill] sm:$0xff]  ;;  %v3799_v35 = vld [vmem:[#allocation72_spill] sm:$0xff]  ;;  %v3805_v34 = vld [vmem:[#allocation75_spill] sm:$0xff] }
  0x6e   :  { %3779 = vst [vmem:[#allocation99_spill] sm:$0xff] %v2435_v10  ;;  %v2540_v60 = vmul.f32 %v3791_v14, %v3791_v14  ;;  %v2544_v63 = vmul.f32 %v3793_v17, %v3793_v17  ;;  %v2548_v53 = vmul.f32 %v3795_v36, %v3795_v36  ;;  %v2560_v14 = vmul.f32 %v3799_v35, %v3799_v35  ;;  %v3801_v27 = vld [vmem:[#allocation73_spill] sm:$0xff]  ;;  %v3811_v10 = vld [vmem:[#allocation6_spill] sm:$0xff] }
  0x6f   :  { %3780 = vst [vmem:[#allocation100_spill] sm:$0xff] %v2439_v13  ;;  %v268_v1 = vadd.f32 %v267_v39, %v223_v23  ;;  %v2552_v23 = vmul.f32 %v2120_v18, %v2120_v18  ;;  %v2556_v39 = vmul.f32 %v2159_v25, %v2159_v25  ;;  %v2564_v17 = vmul.f32 %v3801_v27, %v3801_v27  ;;  %v3809_v13 = vld [vmem:[#allocation77_spill] sm:$0xff] }
  0x70   :  { %3781 = vst [vmem:[#allocation101_spill] sm:$0xff] %v2456_v37  ;;  %v2568_v36 = vmul.f32 %v3803_v57, %v3803_v57  ;;  %v2572_v18 = vmul.f32 %v3805_v34, %v3805_v34  ;;  %v254_v56 = vadd.f32 %v253_v47, %v226_v43  ;;  %v3807_v37 = vld [vmem:[#allocation76_spill] sm:$0xff]  ;;  %v2580_v35 = vmul.f32 %v3809_v13, %v3809_v13  ;;  %v3813_v34 = vld [vmem:[#allocation9_spill] sm:$0xff]  ;;  %v3814_v47 = vld [vmem:[#allocation10_spill] sm:$0xff] }
  0x71   :  { %3782 = vst [vmem:[#allocation102_spill] sm:$0xff] %v2520_v12  ;;  %v2576_v25 = vmul.f32 %v3807_v37, %v3807_v37  ;;  %v2584_v27 = vmul.f32 %v3811_v10, %v3811_v10  ;;  %v3812_v57 = vld [vmem:[#allocation8_spill] sm:$0xff]  ;;  %v2592_v43 = vmul.f32 %v3813_v34, %v3813_v34  ;;  %v2596_v37 = vmul.f32 %v3814_v47, %v3814_v47  ;;  %v3833_v12 = vld [vmem:[#allocation69_spill] sm:$0xff] }
  0x72   :  { %3784 = vst [vmem:[#allocation103_spill] sm:$0xff] %v2524_v19  ;;  %v3831_v19 = vld [vmem:[#allocation67_spill] sm:$0xff] }
  0x73   :  { %3786 = vst [vmem:[#allocation104_spill] sm:$0xff] %v2528_v20 }
  0x74   :  { %3788 = vst [vmem:[#allocation105_spill] sm:$0xff] %v2532_v31 }
  0x75   :  { %3790 = vst [vmem:[#allocation60_spill] sm:$0xff] %v2536_v24  ;;  %v3825_v24 = vld [vmem:[#allocation45_spill] sm:$0xff] }
  0x76   :  { %3792 = vst [vmem:[#allocation61_spill] sm:$0xff] %v2540_v60  ;;  %v3824_v60 = vld [vmem:[#allocation42_spill] sm:$0xff] }
  0x77   :  { %3794 = vst [vmem:[#allocation65_spill] sm:$0xff] %v2544_v63  ;;  %v3823_v63 = vld [vmem:[#allocation38_spill] sm:$0xff] }
  0x78   :  { %3796 = vst [vmem:[#allocation66_spill] sm:$0xff] %v2548_v53  ;;  %v255_v53 = vadd.f32 %v254_v56, %v232_v26  ;;  %v3829_v26 = vld [vmem:[#allocation57_spill] sm:$0xff] }
  0x79   :  { %3797 = vst [vmem:[#allocation106_spill] sm:$0xff] %v2552_v23  ;;  %v3822_v23 = vld [vmem:[#allocation26_spill] sm:$0xff] }
  0x7a   :  { %3798 = vst [vmem:[#allocation107_spill] sm:$0xff] %v2556_v39  ;;  %v3821_v39 = vld [vmem:[#allocation25_spill] sm:$0xff] }
  0x7b   :  { %3800 = vst [vmem:[#allocation72_spill] sm:$0xff] %v2560_v14  ;;  %v3820_v14 = vld [vmem:[#allocation23_spill] sm:$0xff] }
  0x7c   :  { %3802 = vst [vmem:[#allocation73_spill] sm:$0xff] %v2564_v17  ;;  %v269_v17 = vadd.f32 %v268_v1, %v229_v9  ;;  %v3817_v9 = vld [vmem:[#allocation18_spill] sm:$0xff] }
  0x7d   :  { %3804 = vst [vmem:[#allocation74_spill] sm:$0xff] %v2568_v36  ;;  %v2588_v36 = vmul.f32 %v3812_v57, %v3812_v57  ;;  %v2608_v1 = vmul.f32 %v3817_v9, %v3817_v9  ;;  %v3818_v57 = vld [vmem:[#allocation21_spill] sm:$0xff]  ;;  %v2628_v9 = vmul.f32 %v3822_v23, %v3822_v23  ;;  %v3827_v23 = vld [vmem:[#allocation54_spill] sm:$0xff] }
  0x7e   :  { %3806 = vst [vmem:[#allocation75_spill] sm:$0xff] %v2572_v18  ;;  %v2612_v34 = vmul.f32 %v3818_v57, %v3818_v57  ;;  %v3819_v18 = vld [vmem:[#allocation22_spill] sm:$0xff]  ;;  %v2632_v57 = vmul.f32 %v3823_v63, %v3823_v63  ;;  %v270_v31 = vadd.f32 %v269_v17, %v235_v6  ;;  %v2648_v56 = vmul.f32 %v3827_v23, %v3827_v23 }
  0x7f   :  { %3808 = vst [vmem:[#allocation76_spill] sm:$0xff] %v2576_v25  ;;  %v3815_v25 = vld [vmem:[#allocation13_spill] sm:$0xff]  ;;  %v2616_v47 = vmul.f32 %v3819_v18, %v3819_v18  ;;  %v2636_v18 = vmul.f32 %v3824_v60, %v3824_v60  ;;  %v2652_v63 = vmul.f32 %v3829_v26, %v3829_v26  ;;  %v2656_v60 = vmul.f32 %v3831_v19, %v3831_v19 }
  0x80   :  { %3810 = vst [vmem:[#allocation77_spill] sm:$0xff] %v2580_v35  ;;  %v2600_v13 = vmul.f32 %v3815_v25, %v3815_v25  ;;  %v3816_v35 = vld [vmem:[#allocation14_spill] sm:$0xff]  ;;  %v2620_v25 = vmul.f32 %v3820_v14, %v3820_v14  ;;  %v2640_v14 = vmul.f32 %v3825_v24, %v3825_v24  ;;  %v2660_v24 = vmul.f32 %v3833_v12, %v3833_v12 }
  0x81   :  { %v2604_v10 = vmul.f32 %v3816_v35, %v3816_v35  ;;  %v2624_v35 = vmul.f32 %v3821_v39, %v3821_v39  ;;  %v3826_v39 = vld [vmem:[#allocation47_spill] sm:$0xff]  ;;  %3828 = vst [vmem:[#allocation6_spill] sm:$0xff] %v2648_v56  ;;  %v2664_v6 = vmul.f32 %v2221_v50, %v2221_v50  ;;  %v2668_v17 = vmul.f32 %v2235_v62, %v2235_v62 }
  0x82   :  { %v2644_v20 = vmul.f32 %v3826_v39, %v3826_v39  ;;  %3830 = vst [vmem:[#allocation8_spill] sm:$0xff] %v2652_v63  ;;  %v2672_v39 = vmul.f32 %v2261_v22, %v2261_v22  ;;  %v2676_v19 = vmul.f32 %v2266_v46, %v2266_v46  ;;  %v2680_v12 = vmul.f32 %v2277_v59, %v2277_v59 }
  0x83   :  { %3832 = vst [vmem:[#allocation9_spill] sm:$0xff] %v2656_v60  ;;  %v2684_v50 = vmul.f32 %v2293_v7, %v2293_v7  ;;  %v2687_v26 = vadd.f32 %v255_v53, %v2449_v32  ;;  %v2691_v62 = vmul.f32 %v2298_v16, %v2298_v16  ;;  %v2695_v22 = vmul.f32 %v2324_v55, %v2324_v55  ;;  %v3847_v32 = vld [vmem:[#allocation91_spill] sm:$0xff]  ;;  %v3849_v16 = vld [vmem:[#allocation92_spill] sm:$0xff] }
  0x84   :  { %3834 = vst [vmem:[#allocation10_spill] sm:$0xff] %v2660_v24  ;;  %v2699_v46 = vmul.f32 %v2329_v15, %v2329_v15  ;;  %v2702_v59 = vadd.f32 %v270_v31, %v2452_v58  ;;  %v2706_v7 = vmul.f32 %v2334_v0, %v2334_v0  ;;  %v2710_v53 = vmul.f32 %v3847_v32, %v3847_v32  ;;  %v3851_v55 = vld [vmem:[#allocation27_spill] sm:$0xff]  ;;  %v3852_v15 = vld [vmem:[#allocation30_spill] sm:$0xff] }
  0x85   :  { %3835 = vst [vmem:[#allocation13_spill] sm:$0xff] %v2664_v6  ;;  %v2714_v23 = vmul.f32 %v3849_v16, %v3849_v16  ;;  %v3853_v58 = vld [vmem:[#allocation31_spill] sm:$0xff]  ;;  %v3857_v16 = vld [vmem:[#allocation36_spill] sm:$0xff] }
  0x86   :  { %3836 = vst [vmem:[#allocation14_spill] sm:$0xff] %v2668_v17  ;;  %v370_v31 = vmul.f32 %v3853_v58, %v3853_v58  ;;  %v3864_v17 = vld [vmem:[#allocation48_spill] sm:$0xff] }
  0x87   :  { %3837 = vst [vmem:[#allocation18_spill] sm:$0xff] %v2672_v39  ;;  %v3863_v39 = vld [vmem:[#allocation64_spill] sm:$0xff] }
  0x88   :  { %3838 = vst [vmem:[#allocation21_spill] sm:$0xff] %v2676_v19  ;;  %v3866_v6 = vld [vmem:[#allocation52_spill] sm:$0xff] }
  0x89   :  { %3839 = vst [vmem:[#allocation22_spill] sm:$0xff] %v2680_v12  ;;  %v3858_v12 = vld [vmem:[#allocation39_spill] sm:$0xff] }
  0x8a   :  { %3840 = vst [vmem:[#allocation23_spill] sm:$0xff] %v2684_v50 }
  0x8b   :  { %3841 = vst [vmem:[#allocation25_spill] sm:$0xff] %v2687_v26  ;;  %v3860_v26 = vld [vmem:[#allocation43_spill] sm:$0xff] }
  0x8c   :  { %3842 = vst [vmem:[#allocation26_spill] sm:$0xff] %v2691_v62  ;;  %v3854_v62 = vld [vmem:[#allocation32_spill] sm:$0xff]  ;;  %v2736_v58 = vmul.f32 %v3860_v26, %v3860_v26  ;;  %v3870_v26 = vld [vmem:[#allocation58_spill] sm:$0xff] }
  0x8d   :  { %3843 = vst [vmem:[#allocation38_spill] sm:$0xff] %v2695_v22  ;;  %v368_v22 = vmul.f32 %v3851_v55, %v3851_v55  ;;  %v371_v0 = vmul.f32 %v3854_v62, %v3854_v62  ;;  %v375_v55 = vmul.f32 %v3858_v12, %v3858_v12  ;;  %v3861_v62 = vld [vmem:[#allocation46_spill] sm:$0xff]  ;;  %v2750_v12 = vmul.f32 %v3866_v6, %v3866_v6 }
  0x8e   :  { %3844 = vst [vmem:[#allocation42_spill] sm:$0xff] %v2699_v46  ;;  %v369_v46 = vmul.f32 %v3852_v15, %v3852_v15  ;;  %v2740_v19 = vmul.f32 %v3861_v62, %v3861_v62  ;;  %v2758_v60 = vmul.f32 %v3870_v26, %v3870_v26  ;;  %v3872_v62 = vld [vmem:[#allocation62_spill] sm:$0xff]  ;;  %v3880_v26 = vld [vmem:[#allocation79_spill] sm:$0xff] }
  0x8f   :  { %3845 = vst [vmem:[#allocation45_spill] sm:$0xff] %v2702_v59  ;;  %v3859_v59 = vld [vmem:[#allocation40_spill] sm:$0xff]  ;;  %v2762_v63 = vmul.f32 %v3872_v62, %v3872_v62  ;;  %v3882_v62 = vld [vmem:[#allocation7_spill] sm:$0xff] }
  0x90   :  { %3846 = vst [vmem:[#allocation47_spill] sm:$0xff] %v2706_v7  ;;  %v3855_v7 = vld [vmem:[#allocation34_spill] sm:$0xff]  ;;  %v376_v15 = vmul.f32 %v3859_v59, %v3859_v59  ;;  %v3868_v59 = vld [vmem:[#allocation55_spill] sm:$0xff] }
  0x91   :  { %3848 = vst [vmem:[#allocation91_spill] sm:$0xff] %v2710_v53  ;;  %v372_v32 = vmul.f32 %v3855_v7, %v3855_v7  ;;  %v3856_v53 = vld [vmem:[#allocation35_spill] sm:$0xff]  ;;  %v3862_v7 = vld [vmem:[#allocation5_spill] sm:$0xff]  ;;  %v2754_v24 = vmul.f32 %v3868_v59, %v3868_v59 }
  0x92   :  { %3850 = vst [vmem:[#allocation92_spill] sm:$0xff] %v2714_v23  ;;  %v373_v50 = vmul.f32 %v3856_v53, %v3856_v53  ;;  %v374_v23 = vmul.f32 %v3857_v16, %v3857_v16  ;;  %v400_v53 = vadd.f32 %v3863_v39, %v3862_v7  ;;  %v2746_v16 = vmul.f32 %v3864_v17, %v3864_v17  ;;  %v3874_v39 = vld [vmem:[#allocation68_spill] sm:$0xff]  ;;  %v3876_v7 = vld [vmem:[#allocation70_spill] sm:$0xff] }
  0x93   :  { %3867 = vst [vmem:[#allocation30_spill] sm:$0xff] %v2750_v12  ;;  %v2766_v17 = vmul.f32 %v3874_v39, %v3874_v39  ;;  %v2770_v6 = vmul.f32 %v3876_v7, %v3876_v7  ;;  %v3878_v12 = vld [vmem:[#allocation11_spill] sm:$0xff]  ;;  %v3883_v39 = vld [vmem:[#allocation12_spill] sm:$0xff] }
  0x94   :  { %3865 = vst [vmem:[#allocation27_spill] sm:$0xff] %v2746_v16  ;;  %v406_v59 = vadd.f32 %v2464_v61, %v3878_v12  ;;  %v3884_v16 = vld [vmem:[#allocation82_spill] sm:$0xff]  ;;  %v401_v12 = vadd.f32 %v400_v53, %v2584_v27 }
  0x95   :  { %3869 = vst [vmem:[#allocation31_spill] sm:$0xff] %v2754_v24  ;;  %v3879_v24 = vld [vmem:[#allocation78_spill] sm:$0xff]  ;;  %v2788_v7 = vmul.f32 %v3884_v16, %v3884_v16  ;;  %v3890_v16 = vld [vmem:[#allocation17_spill] sm:$0xff] }
  0x96   :  { %3871 = vst [vmem:[#allocation32_spill] sm:$0xff] %v2758_v60  ;;  %v2776_v56 = vmul.f32 %v3879_v24, %v3879_v24  ;;  %v2780_v60 = vmul.f32 %v3880_v26, %v3880_v26  ;;  %v3887_v24 = vld [vmem:[#allocation15_spill] sm:$0xff] }
  0x97   :  { %3873 = vst [vmem:[#allocation34_spill] sm:$0xff] %v2762_v63  ;;  %v403_v63 = vadd.f32 %v2460_v21, %v3882_v62  ;;  %v412_v26 = vadd.f32 %v2472_v3, %v3887_v24  ;;  %v3888_v21 = vld [vmem:[#allocation16_spill] sm:$0xff]  ;;  %v2813_v3 = vmul.f32 %v2378_v54, %v2378_v54  ;;  %v2830_v54 = vmul.f32 %v2400_v5, %v2400_v5 }
  0x98   :  { %3875 = vst [vmem:[#allocation35_spill] sm:$0xff] %v2766_v17  ;;  %v409_v17 = vadd.f32 %v2468_v49, %v3883_v39  ;;  %v415_v49 = vadd.f32 %v2476_v30, %v3888_v21  ;;  %v3889_v39 = vld [vmem:[#allocation19_spill] sm:$0xff]  ;;  %v407_v30 = vadd.f32 %v406_v59, %v2592_v43  ;;  %v402_v43 = vadd.f32 %v401_v12, %v368_v22  ;;  %v3894_v59 = vld [vmem:[#allocation29_spill] sm:$0xff] }
  0x99   :  { %3877 = vst [vmem:[#allocation36_spill] sm:$0xff] %v2770_v6  ;;  %v3886_v6 = vld [vmem:[#allocation84_spill] sm:$0xff]  ;;  %v418_v62 = vadd.f32 %v2480_v40, %v3889_v39  ;;  %v2822_v40 = vmul.f32 %v2388_v33, %v2388_v33  ;;  %v413_v53 = vadd.f32 %v412_v26, %v2600_v13  ;;  %v3895_v21 = vld [vmem:[#allocation59_spill] sm:$0xff] }
  0x9a   :  { %3881 = vst [vmem:[#allocation39_spill] sm:$0xff] %v2780_v60  ;;  %v2792_v61 = vmul.f32 %v3886_v6, %v3886_v6  ;;  %v2799_v60 = vmul.f32 %v2365_v28, %v2365_v28  ;;  %v2809_v6 = vmul.f32 %v2370_v2, %v2370_v2  ;;  %v2817_v28 = vmul.f32 %v2383_v8, %v2383_v8  ;;  %v3891_v2 = vld [vmem:[#allocation24_spill] sm:$0xff]  ;;  %v3898_v12 = vld [vmem:[#allocation63_spill] sm:$0xff] }
  0x9b   :  { %3885 = vst [vmem:[#allocation40_spill] sm:$0xff] %v2788_v7  ;;  %v421_v7 = vadd.f32 %v2484_v41, %v3890_v16  ;;  %v404_v41 = vadd.f32 %v403_v63, %v2588_v36  ;;  %v410_v27 = vadd.f32 %v409_v17, %v2596_v37  ;;  %v424_v24 = vadd.f32 %v2488_v42, %v3891_v2  ;;  %v3892_v63 = vld [vmem:[#allocation20_spill] sm:$0xff]  ;;  %v3903_v2 = vld [vmem:[#allocation83_spill] sm:$0xff] }
  0x9c   :  { %v2834_v8 = vmul.f32 %v2405_v38, %v2405_v38  ;;  %v416_v33 = vadd.f32 %v415_v49, %v2604_v10  ;;  %v419_v36 = vadd.f32 %v418_v62, %v2608_v1  ;;  %v427_v42 = vadd.f32 %v2492_v44, %v3892_v63  ;;  %v3893_v17 = vld [vmem:[#allocation28_spill] sm:$0xff]  ;;  %v3896_v1 = vld [vmem:[#allocation49_spill] sm:$0xff] }
  0x9d   :  { %v422_v37 = vadd.f32 %v421_v7, %v2612_v34  ;;  %v408_v16 = vadd.f32 %v407_v30, %v370_v31  ;;  %v430_v5 = vadd.f32 %v2496_v45, %v3893_v17  ;;  %v433_v38 = vadd.f32 %v2500_v48, %v3894_v59  ;;  %v3897_v7 = vld [vmem:[#allocation71_spill] sm:$0xff]  ;;  %v3899_v30 = vld [vmem:[#allocation80_spill] sm:$0xff]  ;;  %v3912_v59 = vld [vmem:[#allocation61_spill] sm:$0xff] }
  0x9e   :  { %v436_v22 = vadd.f32 %v2504_v51, %v3895_v21  ;;  %v405_v13 = vadd.f32 %v404_v41, %v369_v46  ;;  %v411_v26 = vadd.f32 %v410_v27, %v371_v0  ;;  %v425_v10 = vadd.f32 %v424_v24, %v2616_v47  ;;  %v3909_v63 = vld [vmem:[#allocation60_spill] sm:$0xff]  ;;  %v3914_v21 = vld [vmem:[#allocation65_spill] sm:$0xff] }
  0x9f   :  { %v439_v34 = vadd.f32 %v2508_v52, %v3896_v1  ;;  %v2853_v44 = vmul.f32 %v2410_v29, %v2410_v29  ;;  %v414_v31 = vadd.f32 %v413_v53, %v372_v32  ;;  %v442_v45 = vadd.f32 %v2512_v4, %v3897_v7  ;;  %v3900_v4 = vld [vmem:[#allocation102_spill] sm:$0xff]  ;;  %v3916_v1 = vld [vmem:[#allocation8_spill] sm:$0xff] }
  0xa0   :  { %v445_v48 = vadd.f32 %v2516_v11, %v3898_v12  ;;  %v417_v49 = vadd.f32 %v416_v33, %v373_v50  ;;  %v420_v51 = vadd.f32 %v419_v36, %v374_v23  ;;  %v423_v46 = vadd.f32 %v422_v37, %v375_v55  ;;  %v3901_v50 = vld [vmem:[#allocation81_spill] sm:$0xff]  ;;  %v3907_v36 = vld [vmem:[#allocation27_spill] sm:$0xff] }
  0xa1   :  { %v428_v0 = vadd.f32 %v427_v42, %v2620_v25  ;;  %v431_v47 = vadd.f32 %v430_v5, %v2624_v35  ;;  %v434_v52 = vadd.f32 %v433_v38, %v2628_v9  ;;  %v437_v39 = vadd.f32 %v436_v22, %v2632_v57  ;;  %v3902_v25 = vld [vmem:[#allocation103_spill] sm:$0xff]  ;;  %v3904_v57 = vld [vmem:[#allocation104_spill] sm:$0xff] }
  0xa2   :  { %v496_v29 = vadd.f32 %v408_v16, %v402_v43  ;;  %v426_v62 = vadd.f32 %v425_v10, %v376_v15  ;;  %v440_v32 = vadd.f32 %v439_v34, %v2636_v18  ;;  %v448_v41 = vadd.f32 %v3900_v4, %v3899_v30  ;;  %v3905_v15 = vld [vmem:[#allocation85_spill] sm:$0xff]  ;;  %v3910_v16 = vld [vmem:[#allocation6_spill] sm:$0xff]  ;;  %v3911_v5 = vld [vmem:[#allocation87_spill] sm:$0xff] }
  0xa3   :  { %v511_v27 = vadd.f32 %v411_v26, %v405_v13  ;;  %v443_v11 = vadd.f32 %v442_v45, %v2640_v14  ;;  %v446_v23 = vadd.f32 %v445_v48, %v2644_v20  ;;  %v451_v55 = vadd.f32 %v3902_v25, %v3901_v50  ;;  %v3906_v43 = vld [vmem:[#allocation105_spill] sm:$0xff]  ;;  %v3908_v14 = vld [vmem:[#allocation86_spill] sm:$0xff]  ;;  %v3913_v38 = vld [vmem:[#allocation88_spill] sm:$0xff] }
  0xa4   :  { %v497_v35 = vadd.f32 %v496_v29, %v414_v31  ;;  %v429_v9 = vadd.f32 %v428_v0, %v2736_v58  ;;  %v454_v24 = vadd.f32 %v3904_v57, %v3903_v2  ;;  %v457_v18 = vadd.f32 %v3906_v43, %v3905_v15  ;;  %v3915_v26 = vld [vmem:[#allocation30_spill] sm:$0xff]  ;;  %v3919_v12 = vld [vmem:[#allocation31_spill] sm:$0xff]  ;;  %v3922_v29 = vld [vmem:[#allocation32_spill] sm:$0xff] }
  0xa5   :  { %v512_v53 = vadd.f32 %v511_v27, %v417_v49  ;;  %v432_v33 = vadd.f32 %v431_v47, %v2740_v19  ;;  %v435_v37 = vadd.f32 %v434_v52, %v3907_v36  ;;  %v460_v20 = vadd.f32 %v3909_v63, %v3908_v14  ;;  %v3917_v19 = vld [vmem:[#allocation89_spill] sm:$0xff]  ;;  %v3918_v31 = vld [vmem:[#allocation66_spill] sm:$0xff]  ;;  %v3925_v50 = vld [vmem:[#allocation35_spill] sm:$0xff] }
  0xa6   :  { %v498_v42 = vadd.f32 %v497_v35, %v420_v51  ;;  %v449_v17 = vadd.f32 %v448_v41, %v3910_v16  ;;  %v463_v58 = vadd.f32 %v3912_v59, %v3911_v5  ;;  %v466_v22 = vadd.f32 %v3914_v21, %v3913_v38  ;;  %v3920_v49 = vld [vmem:[#allocation9_spill] sm:$0xff]  ;;  %v3921_v0 = vld [vmem:[#allocation10_spill] sm:$0xff]  ;;  %v3932_v36 = vld [vmem:[#allocation39_spill] sm:$0xff] }
  0xa7   :  { %v513_v13 = vadd.f32 %v512_v53, %v423_v46  ;;  %v438_v10 = vadd.f32 %v437_v39, %v3915_v26  ;;  %v452_v34 = vadd.f32 %v451_v55, %v3916_v1  ;;  %v469_v7 = vadd.f32 %v3918_v31, %v3917_v19  ;;  %v3923_v4 = vld [vmem:[#allocation34_spill] sm:$0xff]  ;;  %v3924_v46 = vld [vmem:[#allocation13_spill] sm:$0xff]  ;;  %v3934_v63 = vld [vmem:[#allocation107_spill] sm:$0xff] }
  0xa8   :  { %v499_v45 = vadd.f32 %v498_v42, %v426_v62  ;;  %v441_v48 = vadd.f32 %v440_v32, %v3919_v12  ;;  %v455_v51 = vadd.f32 %v454_v24, %v3920_v49  ;;  %v458_v47 = vadd.f32 %v457_v18, %v3921_v0  ;;  %v3926_v55 = vld [vmem:[#allocation14_spill] sm:$0xff]  ;;  %v3928_v32 = vld [vmem:[#allocation36_spill] sm:$0xff]  ;;  %v3929_v24 = vld [vmem:[#allocation21_spill] sm:$0xff] }
  0xa9   :  { %v514_v52 = vadd.f32 %v513_v13, %v429_v9  ;;  %v444_v30 = vadd.f32 %v443_v11, %v3922_v29  ;;  %v447_v41 = vadd.f32 %v446_v23, %v3923_v4  ;;  %v461_v27 = vadd.f32 %v460_v20, %v3924_v46  ;;  %v3927_v2 = vld [vmem:[#allocation18_spill] sm:$0xff]  ;;  %v3935_v16 = vld [vmem:[#allocation40_spill] sm:$0xff]  ;;  %v3938_v38 = vld [vmem:[#allocation25_spill] sm:$0xff] }
  0xaa   :  { %v500_v39 = vadd.f32 %v499_v45, %v432_v33  ;;  %v450_v25 = vadd.f32 %v449_v17, %v3925_v50  ;;  %v464_v35 = vadd.f32 %v463_v58, %v3926_v55  ;;  %v467_v62 = vadd.f32 %v466_v22, %v3927_v2  ;;  %v3930_v18 = vld [vmem:[#allocation90_spill] sm:$0xff]  ;;  %v3933_v33 = vld [vmem:[#allocation93_spill] sm:$0xff]  ;;  %v3939_v13 = vld [vmem:[#allocation95_spill] sm:$0xff] }
  0xab   :  { %v515_v57 = vadd.f32 %v514_v52, %v435_v37  ;;  %v453_v15 = vadd.f32 %v452_v34, %v3928_v32  ;;  %v470_v43 = vadd.f32 %v469_v7, %v3929_v24  ;;  %v3931_v9 = vld [vmem:[#allocation106_spill] sm:$0xff]  ;;  %v456_v23 = vadd.f32 %v455_v51, %v2776_v56  ;;  %v3937_v37 = vld [vmem:[#allocation72_spill] sm:$0xff]  ;;  %v3940_v26 = vld [vmem:[#allocation73_spill] sm:$0xff] }
  0xac   :  { %v472_v53 = vadd.f32 %v3931_v9, %v3930_v18  ;;  %v501_v11 = vadd.f32 %v500_v39, %v438_v10  ;;  %v459_v14 = vadd.f32 %v458_v47, %v3932_v36  ;;  %v475_v20 = vadd.f32 %v3934_v63, %v3933_v33  ;;  %v3936_v5 = vld [vmem:[#allocation94_spill] sm:$0xff]  ;;  %v3941_v1 = vld [vmem:[#allocation45_spill] sm:$0xff]  ;;  %v3943_v45 = vld [vmem:[#allocation96_spill] sm:$0xff] }
  0xad   :  { %v516_v42 = vadd.f32 %v515_v57, %v441_v48  ;;  %v462_v17 = vadd.f32 %v461_v27, %v3935_v16  ;;  %v478_v59 = vadd.f32 %v3937_v37, %v3936_v5  ;;  %v526_v21 = vrot.slane %v3938_v38, 4  ;;  %v3942_v31 = vld [vmem:[#allocation22_spill] sm:$0xff]  ;;  %v3945_v0 = vld [vmem:[#allocation23_spill] sm:$0xff]  ;;  %v3949_v46 = vld [vmem:[#allocation100_spill] sm:$0xff] }
  0xae   :  { %v502_v58 = vadd.f32 %v501_v11, %v444_v30  ;;  %v465_v22 = vadd.f32 %v464_v35, %v2792_v61  ;;  %v481_v10 = vadd.f32 %v3940_v26, %v3939_v13  ;;  %v532_v34 = vrot.slane %v3941_v1, 4  ;;  %v3944_v12 = vld [vmem:[#allocation74_spill] sm:$0xff]  ;;  %v3946_v52 = vld [vmem:[#allocation99_spill] sm:$0xff]  ;;  %v3950_v27 = vld [vmem:[#allocation76_spill] sm:$0xff] }
  0xaf   :  { %v517_v56 = vadd.f32 %v516_v42, %v447_v41  ;;  %v468_v19 = vadd.f32 %v467_v62, %v2799_v60  ;;  %v473_v7 = vadd.f32 %v472_v53, %v3942_v31  ;;  %v484_v48 = vadd.f32 %v3944_v12, %v3943_v45  ;;  %v3947_v61 = vld [vmem:[#allocation75_spill] sm:$0xff]  ;;  %v3948_v4 = vld [vmem:[#allocation26_spill] sm:$0xff]  ;;  %v3952_v2 = vld [vmem:[#allocation101_spill] sm:$0xff] }
  0xb0   :  { %v503_v49 = vadd.f32 %v502_v58, %v450_v25  ;;  %v471_v51 = vadd.f32 %v470_v43, %v2809_v6  ;;  %v476_v47 = vadd.f32 %v475_v20, %v3945_v0  ;;  %v487_v29 = vadd.f32 %v3947_v61, %v3946_v52  ;;  %v3951_v55 = vld [vmem:[#allocation38_spill] sm:$0xff]  ;;  %v3953_v25 = vld [vmem:[#allocation77_spill] sm:$0xff]  ;;  %v3957_v36 = vld [vmem:[#allocation47_spill] sm:$0xff] }
  0xb1   :  { %v518_v30 = vadd.f32 %v517_v56, %v453_v15  ;;  %v479_v41 = vadd.f32 %v478_v59, %v3948_v4  ;;  %v490_v39 = vadd.f32 %v3950_v27, %v3949_v46  ;;  %v527_v50 = vadd.f32 %v526_v21, %v3938_v38  ;;  %v3954_v32 = vld [vmem:[#allocation97_spill] sm:$0xff]  ;;  %v3955_v43 = vld [vmem:[#allocation42_spill] sm:$0xff]  ;;  %v3958_v20 = vld [vmem:[#allocation91_spill] sm:$0xff] }
  0xb2   :  { %v504_v60 = vadd.f32 %v503_v49, %v456_v23  ;;  %v482_v35 = vadd.f32 %v481_v10, %v3951_v55  ;;  %v493_v62 = vadd.f32 %v3953_v25, %v3952_v2  ;;  %v533_v57 = vadd.f32 %v532_v34, %v3941_v1  ;;  %v3956_v53 = vld [vmem:[#allocation98_spill] sm:$0xff] }
  0xb3   :  { %v519_v6 = vadd.f32 %v518_v30, %v459_v14  ;;  %v398_v24 = vmul.f32 %v3954_v32, %v3954_v32  ;;  %v474_v15 = vadd.f32 %v473_v7, %v2813_v3  ;;  %v485_v18 = vadd.f32 %v484_v48, %v3955_v43  ;;  %v3959_v3 = vld [vmem:[#allocation92_spill] sm:$0xff] }
  0xb4   :  { %v505_v9 = vadd.f32 %v504_v60, %v462_v17  ;;  %v399_v11 = vmul.f32 %v3956_v53, %v3956_v53  ;;  %v477_v23 = vadd.f32 %v476_v47, %v2817_v28  ;;  %v488_v33 = vadd.f32 %v487_v29, %v3957_v36 }
  0xb5   :  { %v520_v63 = vadd.f32 %v519_v6, %v465_v22  ;;  %v480_v14 = vadd.f32 %v479_v41, %v2822_v40  ;;  %v491_v42 = vadd.f32 %v490_v39, %v3958_v20  ;;  %v528_v5 = vrot.slane %v527_v50, 2 }
  0xb6   :  { %v506_v16 = vadd.f32 %v505_v9, %v468_v19  ;;  %v483_v37 = vadd.f32 %v482_v35, %v2830_v54  ;;  %v494_v59 = vadd.f32 %v493_v62, %v3959_v3  ;;  %v534_v17 = vrot.slane %v533_v57, 2 }
  0xb7   :  { %v521_v58 = vadd.f32 %v520_v63, %v471_v51  ;;  %v486_v38 = vadd.f32 %v485_v18, %v2834_v8  ;;  %v489_v28 = vadd.f32 %v488_v33, %v2853_v44  ;;  %v492_v26 = vadd.f32 %v491_v42, %v398_v24 }
  0xb8   :  { %v507_v21 = vadd.f32 %v506_v16, %v474_v15  ;;  %v529_v10 = vadd.f32 %v528_v5, %v527_v50  ;;  %v495_v40 = vadd.f32 %v494_v59, %v399_v11  ;;  %v535_v1 = vadd.f32 %v534_v17, %v533_v57 }
  0xb9   :  { %v522_v13 = vadd.f32 %v521_v58, %v477_v23  ;;  %v3960_v58 = vld [vmem:[#allocation33_spill] sm:$0xff] }
  0xba   :  { %v508_v22 = vadd.f32 %v507_v21, %v480_v14  ;;  %v530_v54 = vrot.slane %v529_v10, 1  ;;  %v536_v45 = vrot.slane %v535_v1, 1  ;;  %v558_v14 = vld [vmem:[%s3602_s1] sm:$0x3] }
  0xbb   :  { %v523_v56 = vadd.f32 %v522_v13, %v483_v37 }
  0xbc   :  { %v509_v34 = vadd.f32 %v508_v22, %v486_v38  ;;  %v531_v49 = vadd.f32 %v530_v54, %v529_v10  ;;  %v537_v51 = vadd.f32 %v536_v45, %v535_v1  ;;  %v3961_v38 = vld [vmem:[#allocation41_spill] sm:$0xff] }
  0xbd   :  { %v524_v19 = vadd.f32 %v523_v56, %v489_v28  ;;  %v3962_v28 = vld [vmem:[#allocation54_spill] sm:$0xff]  ;;  %v3964_v10 = vld [vmem:[#allocation37_spill] sm:$0xff]  ;;  %v3965_v56 = vld [vmem:[#allocation44_spill] sm:$0xff] }
  0xbe   :  { %v510_v31 = vadd.f32 %v509_v34, %v492_v26  ;;  %v538_v52 = vmul.f32 0.001953125, %v531_v49  ;;  %v539_v29 = vmul.f32 0.001953125, %v537_v51  ;;  %v3963_v26 = vld [vmem:[#allocation68_spill] sm:$0xff]  ;;  %v588_v34 = vld [vmem:[%s3603_s2] sm:$0x3] }
  0xbf   :  { %v525_v7 = vadd.f32 %v524_v19, %v495_v40  ;;  %v1355_v49 = vld [vmem:[%s3601_s0 + $0x100] sm:$0xff] }
  0xc0   :  { %v540_v12 = vrot.slane %v510_v31, 4  ;;  %v554_v27 = vmul.f32 %v538_v52, %v538_v52  ;;  %v555_v60 = vmul.f32 %v539_v29, %v539_v29  ;;  %v1356_v51 = vld [vmem:[%s3601_s0 + $0x200] sm:$0xff] }
  0xc1   :  { %v546_v48 = vrot.slane %v525_v7, 4 }
  0xc2   :  { %v541_v8 = vadd.f32 %v540_v12, %v510_v31  ;;  %v3966_v31 = vld [vmem:[#allocation57_spill] sm:$0xff] }
  0xc3   :  { %v547_v0 = vadd.f32 %v546_v48, %v525_v7  ;;  %v3967_v7 = vld [vmem:[#allocation70_spill] sm:$0xff]  ;;  %v1354_v12 = vld [vmem:[%s3601_s0] sm:$0xff] }
  0xc4   :  { %v542_v44 = vrot.slane %v541_v8, 2 }
  0xc5   :  { %v548_v47 = vrot.slane %v547_v0, 2 }
  0xc6   :  { %v543_v61 = vadd.f32 %v542_v44, %v541_v8  ;;  %v1357_v44 = vld [vmem:[%s3601_s0 + $0x300] sm:$0xff] }
  0xc7   :  { %v549_v30 = vadd.f32 %v548_v47, %v547_v0 }
  0xc8   :  { %v544_v4 = vrot.slane %v543_v61, 1 }
  0xc9   :  { %v550_v41 = vrot.slane %v549_v30, 1 }
  0xca   :  { %v545_v46 = vadd.f32 %v544_v4, %v543_v61 }
  0xcb   :  { %v551_v39 = vadd.f32 %v550_v41, %v549_v30  ;;  %v1359_v30 = vld [vmem:[%s3601_s0 + $0x108] sm:$0xff] }
  0xcc   :  { %v552_v50 = vmul.f32 0.001953125, %v545_v46  ;;  %v1360_v41 = vld [vmem:[%s3601_s0 + $0x208] sm:$0xff] }
  0xcd   :  { %v553_v55 = vmul.f32 0.001953125, %v551_v39 }
  0xce   :  { %v556_v35 = vsub.f32 %v552_v50, %v554_v27  ;;  %v1361_v27 = vld [vmem:[%s3601_s0 + $0x308] sm:$0xff] }
  0xcf   :  { %v557_v2 = vsub.f32 %v553_v55, %v555_v60  ;;  %v3968_v50 = vld [vmem:[#allocation50_spill] sm:$0xff] }
  0xd0   :  { %v559_v25 = vadd.f32 1e-05, %v556_v35  ;;  %v3969_v35 = vld [vmem:[#allocation53_spill] sm:$0xff] }
  0xd1   :  { %v560_v62 = vadd.f32 1e-05, %v557_v2 }
  0xd2   :  { %1350 = vrsqrt.f32 %v559_v25  ;;  %vm567_vm0 = vweird.f32 %v559_v25 }
  0xd3   :  { %1352 = vrsqrt.f32 %v560_v62  ;;  %vm577_vm2 = vweird.f32 %v560_v62 }
  0xd8   :  { %v1351_v6 = vpop.eup %1350 }
  0xd9   :  { %v1353_v57 = vpop.eup %1352  ;;  %v562_v32 = vmul.f32 %v1351_v6, %v559_v25  ;;  %vm568_vm1 = vweird.f32 %v1351_v6  ;;  %v3970_v25 = vld [vmem:[#allocation67_spill] sm:$0xff] }
  0xda   :  { %v572_v24 = vmul.f32 %v1353_v57, %v560_v62  ;;  %vm578_vm3 = vweird.f32 %v1353_v57  ;;  %vm569_vm4 = vmor %vm567_vm0, %vm568_vm1 }
  0xdb   :  { %v563_v15 = vmul.f32 %v1351_v6, %v562_v32  ;;  %vm579_vm5 = vmor %vm577_vm2, %vm578_vm3  ;;  %v3972_v32 = vld [vmem:[#allocation51_spill] sm:$0xff] }
  0xdc   :  { %v573_v43 = vmul.f32 %v1353_v57, %v572_v24 }
  0xdd   :  { %v564_v18 = vmul.f32 0.5, %v563_v15  ;;  %v3973_v15 = vld [vmem:[#allocation56_spill] sm:$0xff] }
  0xde   :  { %v574_v9 = vmul.f32 0.5, %v573_v43 }
  0xdf   :  { %v565_v53 = vsub.f32 1.5, %v564_v18  ;;  %v3974_v18 = vld [vmem:[#allocation69_spill] sm:$0xff] }
  0xe0   :  { %v575_v11 = vsub.f32 1.5, %v574_v9 }
  0xe1   :  { %v566_v23 = vmul.f32 %v1351_v6, %v565_v53 }
  0xe2   :  { %v576_v36 = vmul.f32 %v1353_v57, %v575_v11 }
  0xe3   :  { %v570_v33 = vsel %vm569_vm4, %v1351_v6, %v566_v23  ;;  %v3971_v6 = vld [vmem:[#allocation78_spill] sm:$0xff]  ;;  %v3975_v23 = vld [vmem:[#allocation79_spill] sm:$0xff] }
  0xe4   :  { %v580_v63 = vsel %vm579_vm5, %v1353_v57, %v576_v36 }
  0xe5   :  { %v583_v20 = vrot.slane %v580_v63, 7 }
  0xe7   :  { %v585_v42 = vsel %vm584_vm6, %v570_v33, %v583_v20  ;;  %v1362_v33 = vld [vmem:[%s3601_s0 + $0x10] sm:$0xff] }
  0xe8   :  { %v587_v16 = vmul.f32 %v585_v42, %v558_v14  ;;  %v1363_v14 = vld [vmem:[%s3601_s0 + $0x110] sm:$0xff] }
  0xe9   :  { %v1364_v42 = vld [vmem:[%s3601_s0 + $0x210] sm:$0xff] }
  0xea   :  { %v2947_v5 = vperm.slane %v587_v16, 0  ;;  %v2949_v37 = vperm.slane %v587_v16, 1 }
  0xec   :  { %v594_v3 = vmul.f32 %v2947_v5, %v538_v52  ;;  %v595_v59 = vmul.f32 %v2949_v37, %v539_v29  ;;  %v618_v17 = vmul.f32 %v2947_v5, %v3960_v58  ;;  %v650_v21 = vmul.f32 %v2947_v5, %v3961_v38  ;;  %v1358_v52 = vld [vmem:[%s3601_s0 + $0x8] sm:$0xff]  ;;  %v1366_v58 = vld [vmem:[%s3601_s0 + $0x18] sm:$0xff] }
  0xed   :  { %v682_v13 = vmul.f32 %v2947_v5, %v3962_v28  ;;  %v714_v22 = vmul.f32 %v2947_v5, %v3963_v26  ;;  %v619_v40 = vmul.f32 %v2949_v37, %v3964_v10  ;;  %v651_v1 = vmul.f32 %v2949_v37, %v3965_v56 }
  0xee   :  { %v598_v19 = vrot.slane %v595_v59, 7  ;;  %v683_v54 = vmul.f32 %v2949_v37, %v3966_v31  ;;  %v715_v45 = vmul.f32 %v2949_v37, %v3967_v7  ;;  %v602_v48 = vmul.f32 %v1354_v12, %v2947_v5 }
  0xef   :  { %v634_v8 = vmul.f32 %v1355_v49, %v2947_v5  ;;  %v666_v0 = vmul.f32 %v1356_v51, %v2947_v5  ;;  %v698_v47 = vmul.f32 %v1357_v44, %v2947_v5  ;;  %v603_v61 = vmul.f32 %v1358_v52, %v2949_v37 }
  0xf0   :  { %v599_v29 = vsel %vm584_vm6, %v594_v3, %v598_v19  ;;  %v635_v4 = vmul.f32 %v1359_v30, %v2949_v37  ;;  %v667_v46 = vmul.f32 %v1360_v41, %v2949_v37  ;;  %v699_v39 = vmul.f32 %v1361_v27, %v2949_v37  ;;  %v1365_v3 = vld [vmem:[%s3601_s0 + $0x310] sm:$0xff] }
  0xf1   :  { %v601_v60 = vsub.f32 %v588_v34, %v599_v29  ;;  %v620_v55 = vmul.f32 %v2947_v5, %v3968_v50  ;;  %v652_v2 = vmul.f32 %v2947_v5, %v3969_v35  ;;  %v3011_v62 = vmul.f32 %v2947_v5, %v3970_v25 }
  0xf2   :  { %v3015_v57 = vmul.f32 %v2947_v5, %v3971_v6  ;;  %v3019_v24 = vmul.f32 %v2949_v37, %v3972_v32  ;;  %v3023_v43 = vmul.f32 %v2949_v37, %v3973_v15  ;;  %v3027_v9 = vmul.f32 %v2949_v37, %v3974_v18 }
  0xf3   :  { %v3029_v53 = vperm.slane %v601_v60, 0  ;;  %v3031_v11 = vperm.slane %v601_v60, 1  ;;  %v3035_v36 = vmul.f32 %v2949_v37, %v3975_v23  ;;  %v3041_v63 = vmul.f32 %v1362_v33, %v2947_v5 }
  0xf4   :  { %v3047_v20 = vmul.f32 %v1363_v14, %v2947_v5  ;;  %v3053_v16 = vmul.f32 %v1364_v42, %v2947_v5  ;;  %v3059_v59 = vmul.f32 %v1365_v3, %v2947_v5  ;;  %v3065_v38 = vmul.f32 %v1366_v58, %v2949_v37 }
  0xf5   :  { %v751_v28 = vadd.f32 %v3029_v53, %v618_v17  ;;  %v783_v26 = vadd.f32 %v3029_v53, %v650_v21  ;;  %v815_v10 = vadd.f32 %v3029_v53, %v682_v13  ;;  %v847_v56 = vadd.f32 %v3029_v53, %v714_v22 }
  0xf6   :  { %v752_v34 = vadd.f32 %v3031_v11, %v619_v40  ;;  %v784_v19 = vadd.f32 %v3031_v11, %v651_v1  ;;  %v816_v31 = vadd.f32 %v3031_v11, %v683_v54  ;;  %v848_v7 = vadd.f32 %v3031_v11, %v715_v45 }
  0xf7   :  { %v879_v12 = vmax.f32 %v751_v28, 0.0  ;;  %v911_v49 = vmax.f32 %v783_v26, 0.0  ;;  %v943_v51 = vmax.f32 %v815_v10, 0.0  ;;  %v975_v44 = vmax.f32 %v847_v56, 0.0 }
  0xf8   :  { %v880_v52 = vmax.f32 %v752_v34, 0.0  ;;  %v912_v17 = vmax.f32 %v784_v19, 0.0  ;;  %v944_v29 = vmax.f32 %v816_v31, 0.0  ;;  %v976_v21 = vmax.f32 %v848_v7, 0.0 }
  0xf9   :  { %v1007_v30 = vadd.f32 %v911_v49, %v879_v12  ;;  %v735_v13 = vadd.f32 %v3029_v53, %v602_v48  ;;  %v767_v22 = vadd.f32 %v3029_v53, %v634_v8  ;;  %v799_v40 = vadd.f32 %v3029_v53, %v666_v0 }
  0xfa   :  { %v1008_v1 = vadd.f32 %v912_v17, %v880_v52  ;;  %v831_v54 = vadd.f32 %v3029_v53, %v698_v47  ;;  %v736_v45 = vadd.f32 %v3031_v11, %v603_v61  ;;  %v768_v41 = vadd.f32 %v3031_v11, %v635_v4 }
  0xfb   :  { %v1039_v27 = vadd.f32 %v1007_v30, %v943_v51  ;;  %v863_v60 = vmax.f32 %v735_v13, 0.0  ;;  %v895_v50 = vmax.f32 %v767_v22, 0.0  ;;  %v927_v35 = vmax.f32 %v799_v40, 0.0 }
  0xfc   :  { %v1040_v25 = vadd.f32 %v1008_v1, %v944_v29  ;;  %v959_v6 = vmax.f32 %v831_v54, 0.0  ;;  %v800_v32 = vadd.f32 %v3031_v11, %v667_v46  ;;  %v832_v48 = vadd.f32 %v3031_v11, %v699_v39 }
  0xfd   :  { %v1071_v8 = vadd.f32 %v1039_v27, %v975_v44  ;;  %v991_v15 = vadd.f32 %v895_v50, %v863_v60  ;;  %v864_v0 = vmax.f32 %v736_v45, 0.0  ;;  %v896_v18 = vmax.f32 %v768_v41, 0.0 }
  0xfe   :  { %v1072_v23 = vadd.f32 %v1040_v25, %v976_v21  ;;  %v928_v47 = vmax.f32 %v800_v32, 0.0  ;;  %v960_v33 = vmax.f32 %v832_v48, 0.0  ;;  %v753_v61 = vadd.f32 %v3029_v53, %v620_v55  ;;  %v1370_v48 = vld [vmem:[%s3601_s0 + $0xa0] sm:$0xff] }
  0xff   :  { %v1103_v4 = vmul.f32 0.25, %v1071_v8  ;;  %v1023_v14 = vadd.f32 %v991_v15, %v927_v35  ;;  %v992_v42 = vadd.f32 %v896_v18, %v864_v0  ;;  %v785_v3 = vadd.f32 %v3029_v53, %v652_v2 }
 0x100   :  { %v1104_v58 = vmul.f32 0.25, %v1072_v23  ;;  %v817_v46 = vadd.f32 %v3029_v53, %v3011_v62  ;;  %v849_v39 = vadd.f32 %v3029_v53, %v3015_v57  ;;  %v881_v28 = vmax.f32 %v753_v61, 0.0 }
 0x101   :  { %1191 = vmatmul.f32.vlgmr.msra.gmra.mxu2 %v1103_v4  ;;  %v1055_v26 = vadd.f32 %v1023_v14, %v959_v6  ;;  %v1024_v10 = vadd.f32 %v992_v42, %v928_v47  ;;  %v913_v56 = vmax.f32 %v785_v3, 0.0  ;;  %v754_v55 = vadd.f32 %v3031_v11, %v3019_v24  ;;  %v1372_v4 = vld [vmem:[%s3601_s0 + $0x2a0] sm:$0xff] }
 0x102   :  { %1256 = vmatmul.f32.vlgmr.msra.gmra.mxu3 %v1104_v58  ;;  %v945_v34 = vmax.f32 %v817_v46, 0.0  ;;  %v977_v19 = vmax.f32 %v849_v39, 0.0  ;;  %v786_v2 = vadd.f32 %v3031_v11, %v3023_v43  ;;  %v818_v62 = vadd.f32 %v3031_v11, %v3027_v9  ;;  %v3976_v58 = vld [vmem:[#allocation82_spill] sm:$0xff] }
 0x103   :  { %v1087_v31 = vmul.f32 0.25, %v1055_v26  ;;  %v1056_v7 = vadd.f32 %v1024_v10, %v960_v33  ;;  %v1009_v57 = vadd.f32 %v913_v56, %v881_v28  ;;  %v850_v12 = vadd.f32 %v3031_v11, %v3035_v36  ;;  %v1373_v10 = vld [vmem:[%s3601_s0 + $0xa8] sm:$0xff] }
 0x104   :  { %v882_v49 = vmax.f32 %v754_v55, 0.0  ;;  %v914_v51 = vmax.f32 %v786_v2, 0.0  ;;  %v946_v44 = vmax.f32 %v818_v62, 0.0  ;;  %v737_v24 = vadd.f32 %v3029_v53, %v3041_v63  ;;  %v1367_v63 = vld [vmem:[%s3601_s0 + $0x118] sm:$0xff]  ;;  %v1374_v55 = vld [vmem:[%s3601_s0 + $0x1a8] sm:$0xff] }
 0x105   :  { %1167 = vmatmul.f32.vlgmr.msra.gmra.mxu0 %v1087_v31  ;;  %v1088_v52 = vmul.f32 0.25, %v1056_v7  ;;  %v1041_v17 = vadd.f32 %v1009_v57, %v945_v34  ;;  %v978_v29 = vmax.f32 %v850_v12, 0.0  ;;  %v769_v43 = vadd.f32 %v3029_v53, %v3047_v20  ;;  %v1368_v20 = vld [vmem:[%s3601_s0 + $0x218] sm:$0xff]  ;;  %v1375_v12 = vld [vmem:[%s3601_s0 + $0x2a8] sm:$0xff] }
 0x106   :  { %v1010_v9 = vadd.f32 %v914_v51, %v882_v49  ;;  %v801_v21 = vadd.f32 %v3029_v53, %v3053_v16  ;;  %v833_v36 = vadd.f32 %v3029_v53, %v3059_v59  ;;  %v865_v30 = vmax.f32 %v737_v24, 0.0  ;;  %v1369_v59 = vld [vmem:[%s3601_s0 + $0x318] sm:$0xff] }
 0x107   :  { %1232 = vmatmul.f32.vlgmr.msra.gmra.mxu1 %v1088_v52  ;;  %v1073_v13 = vadd.f32 %v1041_v17, %v977_v19  ;;  %v897_v22 = vmax.f32 %v769_v43, 0.0  ;;  %v637_v40 = vmul.f32 %v1367_v63, %v2949_v37  ;;  %v669_v1 = vmul.f32 %v1368_v20, %v2949_v37  ;;  %v3977_v51 = vld [vmem:[#allocation84_spill] sm:$0xff] }
 0x108   :  { %v1042_v16 = vadd.f32 %v1010_v9, %v946_v44  ;;  %v929_v54 = vmax.f32 %v801_v21, 0.0  ;;  %v961_v45 = vmax.f32 %v833_v36, 0.0  ;;  %v701_v41 = vmul.f32 %v1369_v59, %v2949_v37  ;;  %v1376_v36 = vld [vmem:[%s3601_s0 + $0x20] sm:$0xff] }
 0x109   :  { %v1105_v27 = vmul.f32 0.25, %v1073_v13  ;;  %v993_v60 = vadd.f32 %v897_v22, %v865_v30  ;;  %v738_v50 = vadd.f32 %v3031_v11, %v3065_v38  ;;  %v770_v35 = vadd.f32 %v3031_v11, %v637_v40  ;;  %v1371_v38 = vld [vmem:[%s3601_s0 + $0x1a0] sm:$0xff] }
 0x10a   :  { %v1074_v25 = vadd.f32 %v1042_v16, %v978_v29  ;;  %v802_v6 = vadd.f32 %v3031_v11, %v669_v1  ;;  %v834_v32 = vadd.f32 %v3031_v11, %v701_v41  ;;  %v622_v8 = vmul.f32 %v1370_v48, %v2947_v5  ;;  %v1377_v40 = vld [vmem:[%s3601_s0 + $0x120] sm:$0xff] }
 0x10b   :  { %1194 = vmatmul.f32.gmra.mxu2 %v1105_v27  ;;  %v1025_v15 = vadd.f32 %v993_v60, %v929_v54  ;;  %v866_v0 = vmax.f32 %v738_v50, 0.0  ;;  %v898_v18 = vmax.f32 %v770_v35, 0.0  ;;  %v654_v23 = vmul.f32 %v1371_v38, %v2947_v5  ;;  %v1379_v27 = vld [vmem:[%s3601_s0 + $0x320] sm:$0xff] }
 0x10c   :  { %v1106_v47 = vmul.f32 0.25, %v1074_v25  ;;  %v930_v33 = vmax.f32 %v802_v6, 0.0  ;;  %v962_v61 = vmax.f32 %v834_v32, 0.0  ;;  %v686_v14 = vmul.f32 %v1372_v4, %v2947_v5  ;;  %v1380_v32 = vld [vmem:[%s3601_s0 + $0x28] sm:$0xff] }
 0x10d   :  { %v1057_v42 = vadd.f32 %v1025_v15, %v961_v45  ;;  %v994_v3 = vadd.f32 %v898_v18, %v866_v0  ;;  %v718_v46 = vmul.f32 %v2947_v5, %v3976_v58  ;;  %v755_v39 = vadd.f32 %v3029_v53, %v622_v8  ;;  %v1378_v45 = vld [vmem:[%s3601_s0 + $0x220] sm:$0xff]  ;;  %v1381_v8 = vld [vmem:[%s3601_s0 + $0x128] sm:$0xff] }
 0x10e   :  { %1259 = vmatmul.f32.gmra.mxu3 %v1106_v47  ;;  %v787_v28 = vadd.f32 %v3029_v53, %v654_v23  ;;  %v819_v26 = vadd.f32 %v3029_v53, %v686_v14  ;;  %v623_v56 = vmul.f32 %v1373_v10, %v2949_v37  ;;  %v655_v34 = vmul.f32 %v1374_v55, %v2949_v37  ;;  %v1383_v14 = vld [vmem:[%s3601_s0 + $0x328] sm:$0xff] }
 0x10f   :  { %v1089_v19 = vmul.f32 0.25, %v1057_v42  ;;  %v1026_v2 = vadd.f32 %v994_v3, %v930_v33  ;;  %v851_v62 = vadd.f32 %v3029_v53, %v718_v46  ;;  %v883_v31 = vmax.f32 %v755_v39, 0.0 }
 0x110   :  { %v915_v7 = vmax.f32 %v787_v28, 0.0  ;;  %v947_v57 = vmax.f32 %v819_v26, 0.0  ;;  %v687_v49 = vmul.f32 %v1375_v12, %v2949_v37  ;;  %v719_v44 = vmul.f32 %v2949_v37, %v3977_v51 }
 0x111   :  { %1170 = vmatmul.f32.gmra.mxu0 %v1089_v19  ;;  %v1058_v24 = vadd.f32 %v1026_v2, %v962_v61  ;;  %v979_v52 = vmax.f32 %v851_v62, 0.0  ;;  %v756_v17 = vadd.f32 %v3031_v11, %v623_v56  ;;  %v788_v29 = vadd.f32 %v3031_v11, %v655_v34  ;;  %v1382_v61 = vld [vmem:[%s3601_s0 + $0x228] sm:$0xff]  ;;  %v1384_v56 = vld [vmem:[%s3601_s0 + $0xb0] sm:$0xff] }
 0x112   :  { %v1011_v43 = vadd.f32 %v915_v7, %v883_v31  ;;  %v820_v9 = vadd.f32 %v3031_v11, %v687_v49  ;;  %v852_v21 = vadd.f32 %v3031_v11, %v719_v44  ;;  %v606_v30 = vmul.f32 %v1376_v36, %v2947_v5  ;;  %v1385_v62 = vld [vmem:[%s3601_s0 + $0x1b0] sm:$0xff] }
 0x113   :  { %v1090_v13 = vmul.f32 0.25, %v1058_v24  ;;  %v884_v22 = vmax.f32 %v756_v17, 0.0  ;;  %v916_v63 = vmax.f32 %v788_v29, 0.0  ;;  %v638_v20 = vmul.f32 %v1377_v40, %v2947_v5  ;;  %v1386_v49 = vld [vmem:[%s3601_s0 + $0x2b0] sm:$0xff] }
 0x114   :  { %v1043_v1 = vadd.f32 %v1011_v43, %v947_v57  ;;  %v948_v16 = vmax.f32 %v820_v9, 0.0  ;;  %v980_v54 = vmax.f32 %v852_v21, 0.0  ;;  %v670_v59 = vmul.f32 %v1378_v45, %v2947_v5  ;;  %v1387_v24 = vld [vmem:[%s3601_s0 + $0x3b0] sm:$0xff]  ;;  %v1388_v21 = vld [vmem:[%s3601_s0 + $0xb8] sm:$0xff] }
 0x115   :  { %1235 = vmatmul.f32.gmra.mxu1 %v1090_v13  ;;  %v1012_v41 = vadd.f32 %v916_v63, %v884_v22  ;;  %v702_v60 = vmul.f32 %v1379_v27, %v2947_v5  ;;  %v739_v50 = vadd.f32 %v3029_v53, %v606_v30  ;;  %v771_v35 = vadd.f32 %v3029_v53, %v638_v20  ;;  %v1389_v30 = vld [vmem:[%s3601_s0 + $0x1b8] sm:$0xff] }
 0x116   :  { %v1075_v25 = vadd.f32 %v1043_v1, %v979_v52  ;;  %v803_v6 = vadd.f32 %v3029_v53, %v670_v59  ;;  %v607_v48 = vmul.f32 %v1380_v32, %v2949_v37  ;;  %v639_v15 = vmul.f32 %v1381_v8, %v2949_v37  ;;  %v1391_v59 = vld [vmem:[%s3601_s0 + $0x3b8] sm:$0xff] }
 0x117   :  { %v1044_v0 = vadd.f32 %v1012_v41, %v948_v16  ;;  %v835_v18 = vadd.f32 %v3029_v53, %v702_v60  ;;  %v867_v38 = vmax.f32 %v739_v50, 0.0  ;;  %v899_v23 = vmax.f32 %v771_v35, 0.0 }
 0x118   :  { %v1107_v47 = vmul.f32 0.25, %v1075_v25  ;;  %v931_v33 = vmax.f32 %v803_v6, 0.0  ;;  %v671_v4 = vmul.f32 %v1382_v61, %v2949_v37  ;;  %v703_v42 = vmul.f32 %v1383_v14, %v2949_v37 }
 0x119   :  { %v1076_v3 = vadd.f32 %v1044_v0, %v980_v54  ;;  %v963_v58 = vmax.f32 %v835_v18, 0.0  ;;  %v995_v46 = vadd.f32 %v899_v23, %v867_v38  ;;  %v740_v39 = vadd.f32 %v3031_v11, %v607_v48  ;;  %v1390_v54 = vld [vmem:[%s3601_s0 + $0x2b8] sm:$0xff]  ;;  %v1392_v48 = vld [vmem:[%s3601_s0 + $0x30] sm:$0xff] }
 0x11a   :  { %1197 = vmatmul.f32.gmra.mxu2 %v1107_v47  ;;  %v772_v28 = vadd.f32 %v3031_v11, %v639_v15  ;;  %v804_v26 = vadd.f32 %v3031_v11, %v671_v4  ;;  %v836_v10 = vadd.f32 %v3031_v11, %v703_v42  ;;  %v624_v55 = vmul.f32 %v1384_v56, %v2947_v5  ;;  %v1393_v38 = vld [vmem:[%s3601_s0 + $0x130] sm:$0xff] }
 0x11b   :  { %v1108_v34 = vmul.f32 0.25, %v1076_v3  ;;  %v1027_v19 = vadd.f32 %v995_v46, %v931_v33  ;;  %v868_v2 = vmax.f32 %v740_v39, 0.0  ;;  %v656_v31 = vmul.f32 %v1385_v62, %v2947_v5  ;;  %v1394_v4 = vld [vmem:[%s3601_s0 + $0x230] sm:$0xff] }
 0x11c   :  { %v900_v7 = vmax.f32 %v772_v28, 0.0  ;;  %v932_v57 = vmax.f32 %v804_v26, 0.0  ;;  %v964_v12 = vmax.f32 %v836_v10, 0.0  ;;  %v688_v51 = vmul.f32 %v1386_v49, %v2947_v5  ;;  %v1396_v10 = vld [vmem:[%s3601_s0 + $0x38] sm:$0xff] }
 0x11d   :  { %1262 = vmatmul.f32.gmra.mxu3 %v1108_v34  ;;  %v1059_v44 = vadd.f32 %v1027_v19, %v963_v58  ;;  %v720_v52 = vmul.f32 %v1387_v24, %v2947_v5  ;;  %v757_v17 = vadd.f32 %v3029_v53, %v624_v55  ;;  %v789_v29 = vadd.f32 %v3029_v53, %v656_v31  ;;  %v1395_v58 = vld [vmem:[%s3601_s0 + $0x330] sm:$0xff]  ;;  %v1397_v55 = vld [vmem:[%s3601_s0 + $0x138] sm:$0xff] }
 0x11e   :  { %v996_v43 = vadd.f32 %v900_v7, %v868_v2  ;;  %v821_v9 = vadd.f32 %v3029_v53, %v688_v51  ;;  %v625_v36 = vmul.f32 %v1388_v21, %v2949_v37  ;;  %v657_v13 = vmul.f32 %v1389_v30, %v2949_v37  ;;  %v1399_v51 = vld [vmem:[%s3601_s0 + $0x338] sm:$0xff] }
 0x11f   :  { %v1091_v22 = vmul.f32 0.25, %v1059_v44  ;;  %v853_v63 = vadd.f32 %v3029_v53, %v720_v52  ;;  %v885_v40 = vmax.f32 %v757_v17, 0.0  ;;  %v917_v20 = vmax.f32 %v789_v29, 0.0 }
 0x120   :  { %v1028_v1 = vadd.f32 %v996_v43, %v932_v57  ;;  %v949_v16 = vmax.f32 %v821_v9, 0.0  ;;  %v689_v45 = vmul.f32 %v1390_v54, %v2949_v37  ;;  %v721_v41 = vmul.f32 %v1391_v59, %v2949_v37 }
 0x121   :  { %1173 = vmatmul.f32.gmra.mxu0 %v1091_v22  ;;  %v981_v27 = vmax.f32 %v853_v63, 0.0  ;;  %v1013_v60 = vadd.f32 %v917_v20, %v885_v40  ;;  %v758_v50 = vadd.f32 %v3031_v11, %v625_v36  ;;  %v790_v35 = vadd.f32 %v3031_v11, %v657_v13  ;;  %v1400_v36 = vld [vmem:[%s3601_s0 + $0xc0] sm:$0xff] }
 0x122   :  { %v1060_v25 = vadd.f32 %v1028_v1, %v964_v12  ;;  %v822_v6 = vadd.f32 %v3031_v11, %v689_v45  ;;  %v854_v32 = vadd.f32 %v3031_v11, %v721_v41  ;;  %v608_v8 = vmul.f32 %v1392_v48, %v2947_v5  ;;  %v1398_v12 = vld [vmem:[%s3601_s0 + $0x238] sm:$0xff]  ;;  %v1401_v40 = vld [vmem:[%s3601_s0 + $0x1c0] sm:$0xff] }
 0x123   :  { %v1045_v15 = vadd.f32 %v1013_v60, %v949_v16  ;;  %v886_v0 = vmax.f32 %v758_v50, 0.0  ;;  %v918_v18 = vmax.f32 %v790_v35, 0.0  ;;  %v640_v23 = vmul.f32 %v1393_v38, %v2947_v5  ;;  %v1402_v45 = vld [vmem:[%s3601_s0 + $0x2c0] sm:$0xff] }
 0x124   :  { %v1092_v47 = vmul.f32 0.25, %v1060_v25  ;;  %v950_v33 = vmax.f32 %v822_v6, 0.0  ;;  %v982_v61 = vmax.f32 %v854_v32, 0.0  ;;  %v672_v14 = vmul.f32 %v1394_v4, %v2947_v5  ;;  %v1404_v32 = vld [vmem:[%s3601_s0 + $0xc8] sm:$0xff] }
 0x125   :  { %v1077_v42 = vadd.f32 %v1045_v15, %v981_v27  ;;  %v1014_v3 = vadd.f32 %v918_v18, %v886_v0  ;;  %v704_v46 = vmul.f32 %v1395_v58, %v2947_v5  ;;  %v741_v39 = vadd.f32 %v3029_v53, %v608_v8  ;;  %v1403_v27 = vld [vmem:[%s3601_s0 + $0x3c0] sm:$0xff]  ;;  %v1405_v8 = vld [vmem:[%s3601_s0 + $0x1c8] sm:$0xff] }
 0x126   :  { %1238 = vmatmul.f32.gmra.mxu1 %v1092_v47  ;;  %v773_v28 = vadd.f32 %v3029_v53, %v640_v23  ;;  %v805_v26 = vadd.f32 %v3029_v53, %v672_v14  ;;  %v609_v56 = vmul.f32 %v1396_v10, %v2949_v37  ;;  %v641_v34 = vmul.f32 %v1397_v55, %v2949_v37  ;;  %v1407_v14 = vld [vmem:[%s3601_s0 + $0x3c8] sm:$0xff] }
 0x127   :  { %v1109_v19 = vmul.f32 0.25, %v1077_v42  ;;  %v1046_v2 = vadd.f32 %v1014_v3, %v950_v33  ;;  %v837_v62 = vadd.f32 %v3029_v53, %v704_v46  ;;  %v869_v31 = vmax.f32 %v741_v39, 0.0 }
 0x128   :  { %v901_v7 = vmax.f32 %v773_v28, 0.0  ;;  %v933_v57 = vmax.f32 %v805_v26, 0.0  ;;  %v673_v49 = vmul.f32 %v1398_v12, %v2949_v37  ;;  %v705_v44 = vmul.f32 %v1399_v51, %v2949_v37 }
 0x129   :  { %1200 = vmatmul.f32.gmra.mxu2 %v1109_v19  ;;  %v1078_v24 = vadd.f32 %v1046_v2, %v982_v61  ;;  %v965_v52 = vmax.f32 %v837_v62, 0.0  ;;  %v742_v17 = vadd.f32 %v3031_v11, %v609_v56  ;;  %v774_v29 = vadd.f32 %v3031_v11, %v641_v34  ;;  %v1406_v61 = vld [vmem:[%s3601_s0 + $0x2c8] sm:$0xff]  ;;  %v1408_v56 = vld [vmem:[%s3601_s0 + $0x40] sm:$0xff] }
 0x12a   :  { %v997_v43 = vadd.f32 %v901_v7, %v869_v31  ;;  %v806_v9 = vadd.f32 %v3031_v11, %v673_v49  ;;  %v838_v21 = vadd.f32 %v3031_v11, %v705_v44  ;;  %v626_v30 = vmul.f32 %v1400_v36, %v2947_v5  ;;  %v1409_v62 = vld [vmem:[%s3601_s0 + $0x140] sm:$0xff] }
 0x12b   :  { %v1110_v13 = vmul.f32 0.25, %v1078_v24  ;;  %v870_v22 = vmax.f32 %v742_v17, 0.0  ;;  %v902_v63 = vmax.f32 %v774_v29, 0.0  ;;  %v658_v20 = vmul.f32 %v1401_v40, %v2947_v5  ;;  %v1410_v49 = vld [vmem:[%s3601_s0 + $0x240] sm:$0xff] }
 0x12c   :  { %v1029_v1 = vadd.f32 %v997_v43, %v933_v57  ;;  %v934_v16 = vmax.f32 %v806_v9, 0.0  ;;  %v966_v54 = vmax.f32 %v838_v21, 0.0  ;;  %v690_v59 = vmul.f32 %v1402_v45, %v2947_v5  ;;  %v1411_v24 = vld [vmem:[%s3601_s0 + $0x340] sm:$0xff]  ;;  %v1412_v21 = vld [vmem:[%s3601_s0 + $0x48] sm:$0xff] }
 0x12d   :  { %1265 = vmatmul.f32.gmra.mxu3 %v1110_v13  ;;  %v998_v41 = vadd.f32 %v902_v63, %v870_v22  ;;  %v722_v60 = vmul.f32 %v1403_v27, %v2947_v5  ;;  %v759_v50 = vadd.f32 %v3029_v53, %v626_v30  ;;  %v791_v35 = vadd.f32 %v3029_v53, %v658_v20  ;;  %v1413_v30 = vld [vmem:[%s3601_s0 + $0x148] sm:$0xff] }
 0x12e   :  { %v1061_v25 = vadd.f32 %v1029_v1, %v965_v52  ;;  %v823_v6 = vadd.f32 %v3029_v53, %v690_v59  ;;  %v627_v48 = vmul.f32 %v1404_v32, %v2949_v37  ;;  %v659_v15 = vmul.f32 %v1405_v8, %v2949_v37  ;;  %v1415_v59 = vld [vmem:[%s3601_s0 + $0x348] sm:$0xff] }
 0x12f   :  { %v1030_v0 = vadd.f32 %v998_v41, %v934_v16  ;;  %v855_v18 = vadd.f32 %v3029_v53, %v722_v60  ;;  %v887_v38 = vmax.f32 %v759_v50, 0.0  ;;  %v919_v23 = vmax.f32 %v791_v35, 0.0 }
 0x130   :  { %v1093_v47 = vmul.f32 0.25, %v1061_v25  ;;  %v951_v33 = vmax.f32 %v823_v6, 0.0  ;;  %v691_v4 = vmul.f32 %v1406_v61, %v2949_v37  ;;  %v723_v42 = vmul.f32 %v1407_v14, %v2949_v37 }
 0x131   :  { %v1062_v3 = vadd.f32 %v1030_v0, %v966_v54  ;;  %v983_v58 = vmax.f32 %v855_v18, 0.0  ;;  %v1015_v46 = vadd.f32 %v919_v23, %v887_v38  ;;  %v760_v39 = vadd.f32 %v3031_v11, %v627_v48  ;;  %v1414_v54 = vld [vmem:[%s3601_s0 + $0x248] sm:$0xff]  ;;  %v1416_v48 = vld [vmem:[%s3601_s0 + $0xd0] sm:$0xff] }
 0x132   :  { %1176 = vmatmul.f32.gmra.mxu0 %v1093_v47  ;;  %v792_v28 = vadd.f32 %v3031_v11, %v659_v15  ;;  %v824_v26 = vadd.f32 %v3031_v11, %v691_v4  ;;  %v856_v10 = vadd.f32 %v3031_v11, %v723_v42  ;;  %v610_v55 = vmul.f32 %v1408_v56, %v2947_v5  ;;  %v1417_v38 = vld [vmem:[%s3601_s0 + $0x1d0] sm:$0xff] }
 0x133   :  { %v1094_v34 = vmul.f32 0.25, %v1062_v3  ;;  %v1047_v19 = vadd.f32 %v1015_v46, %v951_v33  ;;  %v888_v2 = vmax.f32 %v760_v39, 0.0  ;;  %v642_v31 = vmul.f32 %v1409_v62, %v2947_v5  ;;  %v1418_v4 = vld [vmem:[%s3601_s0 + $0x2d0] sm:$0xff] }
 0x134   :  { %v920_v7 = vmax.f32 %v792_v28, 0.0  ;;  %v952_v57 = vmax.f32 %v824_v26, 0.0  ;;  %v984_v12 = vmax.f32 %v856_v10, 0.0  ;;  %v674_v51 = vmul.f32 %v1410_v49, %v2947_v5  ;;  %v1420_v10 = vld [vmem:[%s3601_s0 + $0xd8] sm:$0xff] }
 0x135   :  { %1241 = vmatmul.f32.gmra.mxu1 %v1094_v34  ;;  %v1079_v44 = vadd.f32 %v1047_v19, %v983_v58  ;;  %v706_v52 = vmul.f32 %v1411_v24, %v2947_v5  ;;  %v743_v17 = vadd.f32 %v3029_v53, %v610_v55  ;;  %v775_v29 = vadd.f32 %v3029_v53, %v642_v31  ;;  %v1419_v58 = vld [vmem:[%s3601_s0 + $0x3d0] sm:$0xff]  ;;  %v1421_v55 = vld [vmem:[%s3601_s0 + $0x1d8] sm:$0xff] }
 0x136   :  { %v1016_v43 = vadd.f32 %v920_v7, %v888_v2  ;;  %v807_v9 = vadd.f32 %v3029_v53, %v674_v51  ;;  %v611_v36 = vmul.f32 %v1412_v21, %v2949_v37  ;;  %v643_v13 = vmul.f32 %v1413_v30, %v2949_v37  ;;  %v1423_v51 = vld [vmem:[%s3601_s0 + $0x3d8] sm:$0xff] }
 0x137   :  { %v1111_v22 = vmul.f32 0.25, %v1079_v44  ;;  %v839_v63 = vadd.f32 %v3029_v53, %v706_v52  ;;  %v871_v40 = vmax.f32 %v743_v17, 0.0  ;;  %v903_v20 = vmax.f32 %v775_v29, 0.0 }
 0x138   :  { %v1048_v1 = vadd.f32 %v1016_v43, %v952_v57  ;;  %v935_v16 = vmax.f32 %v807_v9, 0.0  ;;  %v675_v45 = vmul.f32 %v1414_v54, %v2949_v37  ;;  %v707_v41 = vmul.f32 %v1415_v59, %v2949_v37 }
 0x139   :  { %1203 = vmatmul.f32.gmra.mxu2 %v1111_v22  ;;  %v967_v27 = vmax.f32 %v839_v63, 0.0  ;;  %v999_v60 = vadd.f32 %v903_v20, %v871_v40  ;;  %v744_v50 = vadd.f32 %v3031_v11, %v611_v36  ;;  %v776_v35 = vadd.f32 %v3031_v11, %v643_v13  ;;  %v1424_v36 = vld [vmem:[%s3601_s0 + $0x50] sm:$0xff] }
 0x13a   :  { %v1080_v25 = vadd.f32 %v1048_v1, %v984_v12  ;;  %v808_v6 = vadd.f32 %v3031_v11, %v675_v45  ;;  %v840_v32 = vadd.f32 %v3031_v11, %v707_v41  ;;  %v628_v8 = vmul.f32 %v1416_v48, %v2947_v5  ;;  %v1422_v12 = vld [vmem:[%s3601_s0 + $0x2d8] sm:$0xff]  ;;  %v1425_v40 = vld [vmem:[%s3601_s0 + $0x150] sm:$0xff] }
 0x13b   :  { %v1031_v15 = vadd.f32 %v999_v60, %v935_v16  ;;  %v872_v0 = vmax.f32 %v744_v50, 0.0  ;;  %v904_v18 = vmax.f32 %v776_v35, 0.0  ;;  %v660_v23 = vmul.f32 %v1417_v38, %v2947_v5  ;;  %v1426_v45 = vld [vmem:[%s3601_s0 + $0x250] sm:$0xff] }
 0x13c   :  { %v1112_v47 = vmul.f32 0.25, %v1080_v25  ;;  %v936_v33 = vmax.f32 %v808_v6, 0.0  ;;  %v968_v61 = vmax.f32 %v840_v32, 0.0  ;;  %v692_v14 = vmul.f32 %v1418_v4, %v2947_v5  ;;  %v1428_v32 = vld [vmem:[%s3601_s0 + $0x58] sm:$0xff] }
 0x13d   :  { %v1063_v42 = vadd.f32 %v1031_v15, %v967_v27  ;;  %v1000_v3 = vadd.f32 %v904_v18, %v872_v0  ;;  %v724_v46 = vmul.f32 %v1419_v58, %v2947_v5  ;;  %v761_v39 = vadd.f32 %v3029_v53, %v628_v8  ;;  %v1427_v27 = vld [vmem:[%s3601_s0 + $0x350] sm:$0xff]  ;;  %v1429_v8 = vld [vmem:[%s3601_s0 + $0x158] sm:$0xff] }
 0x13e   :  { %1268 = vmatmul.f32.gmra.mxu3 %v1112_v47  ;;  %v793_v28 = vadd.f32 %v3029_v53, %v660_v23  ;;  %v825_v26 = vadd.f32 %v3029_v53, %v692_v14  ;;  %v629_v56 = vmul.f32 %v1420_v10, %v2949_v37  ;;  %v661_v34 = vmul.f32 %v1421_v55, %v2949_v37  ;;  %v1431_v14 = vld [vmem:[%s3601_s0 + $0x358] sm:$0xff] }
 0x13f   :  { %v1095_v19 = vmul.f32 0.25, %v1063_v42  ;;  %v1032_v2 = vadd.f32 %v1000_v3, %v936_v33  ;;  %v857_v62 = vadd.f32 %v3029_v53, %v724_v46  ;;  %v889_v31 = vmax.f32 %v761_v39, 0.0 }
 0x140   :  { %v921_v7 = vmax.f32 %v793_v28, 0.0  ;;  %v953_v57 = vmax.f32 %v825_v26, 0.0  ;;  %v693_v49 = vmul.f32 %v1422_v12, %v2949_v37  ;;  %v725_v44 = vmul.f32 %v1423_v51, %v2949_v37 }
 0x141   :  { %1179 = vmatmul.f32.gmra.mxu0 %v1095_v19  ;;  %v1064_v24 = vadd.f32 %v1032_v2, %v968_v61  ;;  %v985_v52 = vmax.f32 %v857_v62, 0.0  ;;  %v762_v17 = vadd.f32 %v3031_v11, %v629_v56  ;;  %v794_v29 = vadd.f32 %v3031_v11, %v661_v34  ;;  %v1430_v61 = vld [vmem:[%s3601_s0 + $0x258] sm:$0xff]  ;;  %v1432_v56 = vld [vmem:[%s3601_s0 + $0xe0] sm:$0xff] }
 0x142   :  { %v1017_v43 = vadd.f32 %v921_v7, %v889_v31  ;;  %v826_v9 = vadd.f32 %v3031_v11, %v693_v49  ;;  %v858_v21 = vadd.f32 %v3031_v11, %v725_v44  ;;  %v612_v30 = vmul.f32 %v1424_v36, %v2947_v5  ;;  %v1433_v62 = vld [vmem:[%s3601_s0 + $0x1e0] sm:$0xff] }
 0x143   :  { %v1096_v13 = vmul.f32 0.25, %v1064_v24  ;;  %v890_v22 = vmax.f32 %v762_v17, 0.0  ;;  %v922_v63 = vmax.f32 %v794_v29, 0.0  ;;  %v644_v20 = vmul.f32 %v1425_v40, %v2947_v5  ;;  %v1434_v49 = vld [vmem:[%s3601_s0 + $0x2e0] sm:$0xff] }
 0x144   :  { %v1049_v1 = vadd.f32 %v1017_v43, %v953_v57  ;;  %v954_v16 = vmax.f32 %v826_v9, 0.0  ;;  %v986_v54 = vmax.f32 %v858_v21, 0.0  ;;  %v676_v59 = vmul.f32 %v1426_v45, %v2947_v5  ;;  %v1435_v24 = vld [vmem:[%s3601_s0 + $0x3e0] sm:$0xff]  ;;  %v1436_v21 = vld [vmem:[%s3601_s0 + $0xe8] sm:$0xff] }
 0x145   :  { %1244 = vmatmul.f32.gmra.mxu1 %v1096_v13  ;;  %v1018_v41 = vadd.f32 %v922_v63, %v890_v22  ;;  %v708_v60 = vmul.f32 %v1427_v27, %v2947_v5  ;;  %v745_v50 = vadd.f32 %v3029_v53, %v612_v30  ;;  %v777_v35 = vadd.f32 %v3029_v53, %v644_v20  ;;  %v1437_v30 = vld [vmem:[%s3601_s0 + $0x1e8] sm:$0xff] }
 0x146   :  { %v1081_v25 = vadd.f32 %v1049_v1, %v985_v52  ;;  %v809_v6 = vadd.f32 %v3029_v53, %v676_v59  ;;  %v613_v48 = vmul.f32 %v1428_v32, %v2949_v37  ;;  %v645_v15 = vmul.f32 %v1429_v8, %v2949_v37  ;;  %v1439_v59 = vld [vmem:[%s3601_s0 + $0x3e8] sm:$0xff] }
 0x147   :  { %v1050_v0 = vadd.f32 %v1018_v41, %v954_v16  ;;  %v841_v18 = vadd.f32 %v3029_v53, %v708_v60  ;;  %v873_v38 = vmax.f32 %v745_v50, 0.0  ;;  %v905_v23 = vmax.f32 %v777_v35, 0.0 }
 0x148   :  { %v1113_v47 = vmul.f32 0.25, %v1081_v25  ;;  %v937_v33 = vmax.f32 %v809_v6, 0.0  ;;  %v677_v4 = vmul.f32 %v1430_v61, %v2949_v37  ;;  %v709_v42 = vmul.f32 %v1431_v14, %v2949_v37 }
 0x149   :  { %v1082_v3 = vadd.f32 %v1050_v0, %v986_v54  ;;  %v969_v58 = vmax.f32 %v841_v18, 0.0  ;;  %v1001_v46 = vadd.f32 %v905_v23, %v873_v38  ;;  %v746_v39 = vadd.f32 %v3031_v11, %v613_v48  ;;  %v1438_v54 = vld [vmem:[%s3601_s0 + $0x2e8] sm:$0xff]  ;;  %v1440_v48 = vld [vmem:[%s3601_s0 + $0x60] sm:$0xff] }
 0x14a   :  { %1206 = vmatmul.f32.gmra.mxu2 %v1113_v47  ;;  %v778_v28 = vadd.f32 %v3031_v11, %v645_v15  ;;  %v810_v26 = vadd.f32 %v3031_v11, %v677_v4  ;;  %v842_v10 = vadd.f32 %v3031_v11, %v709_v42  ;;  %v630_v55 = vmul.f32 %v1432_v56, %v2947_v5  ;;  %v1441_v38 = vld [vmem:[%s3601_s0 + $0x160] sm:$0xff] }
 0x14b   :  { %v1114_v34 = vmul.f32 0.25, %v1082_v3  ;;  %v1033_v19 = vadd.f32 %v1001_v46, %v937_v33  ;;  %v874_v2 = vmax.f32 %v746_v39, 0.0  ;;  %v662_v31 = vmul.f32 %v1433_v62, %v2947_v5  ;;  %v1442_v4 = vld [vmem:[%s3601_s0 + $0x260] sm:$0xff] }
 0x14c   :  { %v906_v7 = vmax.f32 %v778_v28, 0.0  ;;  %v938_v57 = vmax.f32 %v810_v26, 0.0  ;;  %v970_v12 = vmax.f32 %v842_v10, 0.0  ;;  %v694_v51 = vmul.f32 %v1434_v49, %v2947_v5  ;;  %v1444_v10 = vld [vmem:[%s3601_s0 + $0x68] sm:$0xff] }
 0x14d   :  { %1271 = vmatmul.f32.gmra.mxu3 %v1114_v34  ;;  %v1065_v44 = vadd.f32 %v1033_v19, %v969_v58  ;;  %v726_v52 = vmul.f32 %v1435_v24, %v2947_v5  ;;  %v763_v17 = vadd.f32 %v3029_v53, %v630_v55  ;;  %v795_v29 = vadd.f32 %v3029_v53, %v662_v31  ;;  %v1443_v58 = vld [vmem:[%s3601_s0 + $0x360] sm:$0xff]  ;;  %v1445_v55 = vld [vmem:[%s3601_s0 + $0x168] sm:$0xff] }
 0x14e   :  { %v1002_v43 = vadd.f32 %v906_v7, %v874_v2  ;;  %v827_v9 = vadd.f32 %v3029_v53, %v694_v51  ;;  %v631_v36 = vmul.f32 %v1436_v21, %v2949_v37  ;;  %v663_v13 = vmul.f32 %v1437_v30, %v2949_v37  ;;  %v1447_v51 = vld [vmem:[%s3601_s0 + $0x368] sm:$0xff] }
 0x14f   :  { %v1097_v22 = vmul.f32 0.25, %v1065_v44  ;;  %v859_v63 = vadd.f32 %v3029_v53, %v726_v52  ;;  %v891_v40 = vmax.f32 %v763_v17, 0.0  ;;  %v923_v20 = vmax.f32 %v795_v29, 0.0 }
 0x150   :  { %v1034_v1 = vadd.f32 %v1002_v43, %v938_v57  ;;  %v955_v16 = vmax.f32 %v827_v9, 0.0  ;;  %v695_v45 = vmul.f32 %v1438_v54, %v2949_v37  ;;  %v727_v41 = vmul.f32 %v1439_v59, %v2949_v37 }
 0x151   :  { %1182 = vmatmul.f32.gmra.mxu0 %v1097_v22  ;;  %v987_v27 = vmax.f32 %v859_v63, 0.0  ;;  %v1019_v60 = vadd.f32 %v923_v20, %v891_v40  ;;  %v764_v50 = vadd.f32 %v3031_v11, %v631_v36  ;;  %v796_v35 = vadd.f32 %v3031_v11, %v663_v13  ;;  %v1448_v36 = vld [vmem:[%s3601_s0 + $0xf0] sm:$0xff] }
 0x152   :  { %v1066_v25 = vadd.f32 %v1034_v1, %v970_v12  ;;  %v828_v6 = vadd.f32 %v3031_v11, %v695_v45  ;;  %v860_v32 = vadd.f32 %v3031_v11, %v727_v41  ;;  %v614_v8 = vmul.f32 %v1440_v48, %v2947_v5  ;;  %v1446_v12 = vld [vmem:[%s3601_s0 + $0x268] sm:$0xff]  ;;  %v1449_v40 = vld [vmem:[%s3601_s0 + $0x1f0] sm:$0xff] }
 0x153   :  { %v1051_v15 = vadd.f32 %v1019_v60, %v955_v16  ;;  %v892_v0 = vmax.f32 %v764_v50, 0.0  ;;  %v924_v18 = vmax.f32 %v796_v35, 0.0  ;;  %v646_v23 = vmul.f32 %v1441_v38, %v2947_v5  ;;  %v1450_v45 = vld [vmem:[%s3601_s0 + $0x2f0] sm:$0xff] }
 0x154   :  { %v1098_v47 = vmul.f32 0.25, %v1066_v25  ;;  %v956_v33 = vmax.f32 %v828_v6, 0.0  ;;  %v988_v61 = vmax.f32 %v860_v32, 0.0  ;;  %v678_v14 = vmul.f32 %v1442_v4, %v2947_v5  ;;  %v1452_v32 = vld [vmem:[%s3601_s0 + $0xf8] sm:$0xff] }
 0x155   :  { %v1083_v42 = vadd.f32 %v1051_v15, %v987_v27  ;;  %v1020_v3 = vadd.f32 %v924_v18, %v892_v0  ;;  %v710_v46 = vmul.f32 %v1443_v58, %v2947_v5  ;;  %v747_v39 = vadd.f32 %v3029_v53, %v614_v8  ;;  %v1451_v27 = vld [vmem:[%s3601_s0 + $0x3f0] sm:$0xff]  ;;  %v1453_v8 = vld [vmem:[%s3601_s0 + $0x1f8] sm:$0xff] }
 0x156   :  { %1247 = vmatmul.f32.gmra.mxu1 %v1098_v47  ;;  %v779_v28 = vadd.f32 %v3029_v53, %v646_v23  ;;  %v811_v26 = vadd.f32 %v3029_v53, %v678_v14  ;;  %v615_v56 = vmul.f32 %v1444_v10, %v2949_v37  ;;  %v647_v34 = vmul.f32 %v1445_v55, %v2949_v37  ;;  %v1455_v14 = vld [vmem:[%s3601_s0 + $0x3f8] sm:$0xff] }
 0x157   :  { %v1115_v19 = vmul.f32 0.25, %v1083_v42  ;;  %v1052_v2 = vadd.f32 %v1020_v3, %v956_v33  ;;  %v843_v62 = vadd.f32 %v3029_v53, %v710_v46  ;;  %v875_v31 = vmax.f32 %v747_v39, 0.0 }
 0x158   :  { %v907_v7 = vmax.f32 %v779_v28, 0.0  ;;  %v939_v57 = vmax.f32 %v811_v26, 0.0  ;;  %v679_v49 = vmul.f32 %v1446_v12, %v2949_v37  ;;  %v711_v44 = vmul.f32 %v1447_v51, %v2949_v37 }
 0x159   :  { %1209 = vmatmul.f32.gmra.mxu2 %v1115_v19  ;;  %v1084_v24 = vadd.f32 %v1052_v2, %v988_v61  ;;  %v971_v52 = vmax.f32 %v843_v62, 0.0  ;;  %v748_v17 = vadd.f32 %v3031_v11, %v615_v56  ;;  %v780_v29 = vadd.f32 %v3031_v11, %v647_v34  ;;  %v1454_v61 = vld [vmem:[%s3601_s0 + $0x2f8] sm:$0xff]  ;;  %v1456_v56 = vld [vmem:[%s3601_s0 + $0x70] sm:$0xff] }
 0x15a   :  { %v1003_v43 = vadd.f32 %v907_v7, %v875_v31  ;;  %v812_v9 = vadd.f32 %v3031_v11, %v679_v49  ;;  %v844_v21 = vadd.f32 %v3031_v11, %v711_v44  ;;  %v632_v30 = vmul.f32 %v1448_v36, %v2947_v5  ;;  %v1457_v62 = vld [vmem:[%s3601_s0 + $0x170] sm:$0xff] }
 0x15b   :  { %v1116_v13 = vmul.f32 0.25, %v1084_v24  ;;  %v876_v22 = vmax.f32 %v748_v17, 0.0  ;;  %v908_v63 = vmax.f32 %v780_v29, 0.0  ;;  %v664_v20 = vmul.f32 %v1449_v40, %v2947_v5  ;;  %v1458_v49 = vld [vmem:[%s3601_s0 + $0x270] sm:$0xff] }
 0x15c   :  { %v1035_v1 = vadd.f32 %v1003_v43, %v939_v57  ;;  %v940_v16 = vmax.f32 %v812_v9, 0.0  ;;  %v972_v54 = vmax.f32 %v844_v21, 0.0  ;;  %v696_v59 = vmul.f32 %v1450_v45, %v2947_v5  ;;  %v1459_v24 = vld [vmem:[%s3601_s0 + $0x370] sm:$0xff]  ;;  %v1460_v21 = vld [vmem:[%s3601_s0 + $0x78] sm:$0xff] }
 0x15d   :  { %1274 = vmatmul.f32.gmra.mxu3 %v1116_v13  ;;  %v1004_v41 = vadd.f32 %v908_v63, %v876_v22  ;;  %v728_v60 = vmul.f32 %v1451_v27, %v2947_v5  ;;  %v765_v50 = vadd.f32 %v3029_v53, %v632_v30  ;;  %v797_v35 = vadd.f32 %v3029_v53, %v664_v20  ;;  %v1461_v30 = vld [vmem:[%s3601_s0 + $0x178] sm:$0xff] }
 0x15e   :  { %v1067_v25 = vadd.f32 %v1035_v1, %v971_v52  ;;  %v829_v6 = vadd.f32 %v3029_v53, %v696_v59  ;;  %v633_v48 = vmul.f32 %v1452_v32, %v2949_v37  ;;  %v665_v15 = vmul.f32 %v1453_v8, %v2949_v37  ;;  %v1463_v45 = vld [vmem:[%s3601_s0 + $0x378] sm:$0xff] }
 0x15f   :  { %v1036_v0 = vadd.f32 %v1004_v41, %v940_v16  ;;  %v861_v18 = vadd.f32 %v3029_v53, %v728_v60  ;;  %v893_v38 = vmax.f32 %v765_v50, 0.0  ;;  %v925_v23 = vmax.f32 %v797_v35, 0.0  ;;  %v1462_v16 = vld [vmem:[%s3601_s0 + $0x278] sm:$0xff]  ;;  %s1490_s0 = smov [#allocation2]  }
 0x160   :  { %v1099_v47 = vmul.f32 0.25, %v1067_v25  ;;  %v957_v33 = vmax.f32 %v829_v6, 0.0  ;;  %v697_v4 = vmul.f32 %v1454_v61, %v2949_v37  ;;  %v729_v42 = vmul.f32 %v1455_v14, %v2949_v37  ;;  %s1301_s6 = sshll.u32 %s1490_s0, 4  ;;  %s1302_s6 = int_to_ptr.vmem [resolvable:$true] %s1301_s6 }
 0x161   :  { %v1068_v3 = vadd.f32 %v1036_v0, %v972_v54  ;;  %v989_v58 = vmax.f32 %v861_v18, 0.0  ;;  %v1021_v46 = vadd.f32 %v925_v23, %v893_v38  ;;  %v766_v39 = vadd.f32 %v3031_v11, %v633_v48 }
 0x162   :  { %1185 = vmatmul.f32.gmra.mxu0 %v1099_v47  ;;  %v798_v28 = vadd.f32 %v3031_v11, %v665_v15  ;;  %v830_v26 = vadd.f32 %v3031_v11, %v697_v4  ;;  %v862_v10 = vadd.f32 %v3031_v11, %v729_v42  ;;  %v616_v55 = vmul.f32 %v1456_v56, %v2947_v5 }
 0x163   :  { %v1100_v34 = vmul.f32 0.25, %v1068_v3  ;;  %v1053_v19 = vadd.f32 %v1021_v46, %v957_v33  ;;  %v894_v2 = vmax.f32 %v766_v39, 0.0  ;;  %v648_v31 = vmul.f32 %v1457_v62, %v2947_v5 }
 0x164   :  { %v926_v7 = vmax.f32 %v798_v28, 0.0  ;;  %v958_v57 = vmax.f32 %v830_v26, 0.0  ;;  %v990_v12 = vmax.f32 %v862_v10, 0.0  ;;  %v680_v51 = vmul.f32 %v1458_v49, %v2947_v5 }
 0x165   :  { %1250 = vmatmul.f32.gmra.mxu1 %v1100_v34  ;;  %v1085_v44 = vadd.f32 %v1053_v19, %v989_v58  ;;  %v712_v52 = vmul.f32 %v1459_v24, %v2947_v5  ;;  %v749_v17 = vadd.f32 %v3029_v53, %v616_v55  ;;  %v781_v29 = vadd.f32 %v3029_v53, %v648_v31 }
 0x166   :  { %v1022_v43 = vadd.f32 %v926_v7, %v894_v2  ;;  %v813_v9 = vadd.f32 %v3029_v53, %v680_v51  ;;  %v617_v36 = vmul.f32 %v1460_v21, %v2949_v37  ;;  %v649_v13 = vmul.f32 %v1461_v30, %v2949_v37 }
 0x167   :  { %v1117_v5 = vmul.f32 0.25, %v1085_v44  ;;  %v845_v22 = vadd.f32 %v3029_v53, %v712_v52  ;;  %v877_v63 = vmax.f32 %v749_v17, 0.0  ;;  %v909_v40 = vmax.f32 %v781_v29, 0.0 }
 0x168   :  { %v1054_v20 = vadd.f32 %v1022_v43, %v958_v57  ;;  %v941_v1 = vmax.f32 %v813_v9, 0.0  ;;  %v681_v54 = vmul.f32 %v1462_v16, %v2949_v37  ;;  %v713_v59 = vmul.f32 %v1463_v45, %v2949_v37 }
 0x169   :  { %1212 = vmatmul.f32.gmra.mxu2 %v1117_v5  ;;  %v973_v41 = vmax.f32 %v845_v22, 0.0  ;;  %v1005_v27 = vadd.f32 %v909_v40, %v877_v63  ;;  %v750_v53 = vadd.f32 %v3031_v11, %v617_v36  ;;  %v782_v60 = vadd.f32 %v3031_v11, %v649_v13 }
 0x16a   :  { %v1086_v50 = vadd.f32 %v1054_v20, %v990_v12  ;;  %v814_v35 = vadd.f32 %v3031_v11, %v681_v54  ;;  %v846_v25 = vadd.f32 %v3031_v11, %v713_v59 }
 0x16b   :  { %v1037_v6 = vadd.f32 %v1005_v27, %v941_v1  ;;  %v878_v32 = vmax.f32 %v750_v53, 0.0  ;;  %v910_v48 = vmax.f32 %v782_v60, 0.0 }
 0x16c   :  { %v1118_v8 = vmul.f32 0.25, %v1086_v50  ;;  %v942_v15 = vmax.f32 %v814_v35, 0.0  ;;  %v974_v18 = vmax.f32 %v846_v25, 0.0 }
 0x16d   :  { %v1069_v0 = vadd.f32 %v1037_v6, %v973_v41  ;;  %v1006_v37 = vadd.f32 %v910_v48, %v878_v32 }
 0x16e   :  { %1277 = vmatmul.f32.gmra.mxu3 %v1118_v8 }
 0x16f   :  { %v1101_v38 = vmul.f32 0.25, %v1069_v0  ;;  %v1038_v23 = vadd.f32 %v1006_v37, %v942_v15 }
 0x171   :  { %1188 = vmatmul.f32.gmra.mxu0 %v1101_v38  ;;  %v1070_v47 = vadd.f32 %v1038_v23, %v974_v18 }
 0x173   :  { %v1102_v33 = vmul.f32 0.25, %v1070_v47 }
 0x175   :  { %1253 = vmatmul.f32.gmra.mxu1 %v1102_v33 }
 0x182   :  { %v1168_v61 = vpop.f32.mrf.mxu0 }
 0x184   :  { %v1192_v4 = vpop.f32.mrf.mxu2  ;;  %v1233_v14 = vpop.f32.mrf.mxu1 }
 0x185   :  { %v1234_v42 = vadd.f32 %v1233_v14, %v1168_v61  ;;  %v1257_v11 = vpop.f32.mrf.mxu3 }
 0x186   :  { %v1258_v3 = vadd.f32 %v1257_v11, %v1192_v4 }
 0x187   :  { %1281 = vst [vmem:[#allocation2] sm:$0xff] %v1234_v42 }
 0x188   :  { %1289 = vst [vmem:[#allocation2 + $0x40] sm:$0xff] %v1258_v3 }
 0x18e   :  { %v1195_v58 = vpop.f32.mrf.mxu2  ;;  %v1171_v46 = vpop.f32.mrf.mxu0 }
 0x191   :  { %v1260_v39 = vpop.f32.mrf.mxu3 }
 0x192   :  { %v1236_v28 = vpop.f32.mrf.mxu1  ;;  %v1261_v26 = vadd.f32 %v1260_v39, %v1195_v58 }
 0x193   :  { %v1237_v10 = vadd.f32 %v1236_v28, %v1171_v46 }
 0x194   :  { %1290 = vst [vmem:[#allocation2 + $0x48] sm:$0xff] %v1261_v26 }
 0x195   :  { %1282 = vst [vmem:[#allocation2 + $0x8] sm:$0xff] %v1237_v10 }
 0x19d   :  { %v1198_v56 = vpop.f32.mrf.mxu2 }
 0x19e   :  { %v1174_v34 = vpop.f32.mrf.mxu0 }
 0x1a0   :  { %v1263_v55 = vpop.f32.mrf.mxu3 }
 0x1a1   :  { %v1264_v19 = vadd.f32 %v1263_v55, %v1198_v56 }
 0x1a3   :  { %v1239_v2 = vpop.f32.mrf.mxu1  ;;  %1291 = vst [vmem:[#allocation2 + $0x50] sm:$0xff] %v1264_v19 }
 0x1a4   :  { %v1240_v62 = vadd.f32 %v1239_v2, %v1174_v34 }
 0x1a6   :  { %1283 = vst [vmem:[#allocation2 + $0x10] sm:$0xff] %v1240_v62 }
 0x1ac   :  { %v1201_v31 = vpop.f32.mrf.mxu2 }
 0x1af   :  { %v1177_v7 = vpop.f32.mrf.mxu0 }
 0x1b0   :  { %v1266_v57 = vpop.f32.mrf.mxu3 }
 0x1b1   :  { %v1267_v12 = vadd.f32 %v1266_v57, %v1201_v31 }
 0x1b2   :  { %v1242_v49 = vpop.f32.mrf.mxu1 }
 0x1b3   :  { %v1243_v51 = vadd.f32 %v1242_v49, %v1177_v7  ;;  %1292 = vst [vmem:[#allocation2 + $0x58] sm:$0xff] %v1267_v12 }
 0x1b5   :  { %1284 = vst [vmem:[#allocation2 + $0x18] sm:$0xff] %v1243_v51 }
 0x1bc   :  { %v1204_v44 = vpop.f32.mrf.mxu2 }
 0x1be   :  { %v1180_v24 = vpop.f32.mrf.mxu0 }
 0x1c1   :  { %v1269_v52 = vpop.f32.mrf.mxu3 }
 0x1c2   :  { %v1245_v17 = vpop.f32.mrf.mxu1  ;;  %v1270_v29 = vadd.f32 %v1269_v52, %v1204_v44 }
 0x1c3   :  { %v1246_v43 = vadd.f32 %v1245_v17, %v1180_v24 }
 0x1c4   :  { %1293 = vst [vmem:[#allocation2 + $0x60] sm:$0xff] %v1270_v29 }
 0x1c5   :  { %1285 = vst [vmem:[#allocation2 + $0x20] sm:$0xff] %v1246_v43 }
 0x1cd   :  { %v1207_v9 = vpop.f32.mrf.mxu2 }
 0x1ce   :  { %v1183_v36 = vpop.f32.mrf.mxu0 }
 0x1d0   :  { %v1272_v21 = vpop.f32.mrf.mxu3 }
 0x1d1   :  { %v1273_v30 = vadd.f32 %v1272_v21, %v1207_v9 }
 0x1d3   :  { %v1248_v13 = vpop.f32.mrf.mxu1  ;;  %1294 = vst [vmem:[#allocation2 + $0x68] sm:$0xff] %v1273_v30 }
 0x1d4   :  { %v1249_v5 = vadd.f32 %v1248_v13, %v1183_v36 }
 0x1d6   :  { %1286 = vst [vmem:[#allocation2 + $0x28] sm:$0xff] %v1249_v5 }
 0x1dc   :  { %v1210_v22 = vpop.f32.mrf.mxu2 }
 0x1df   :  { %v1186_v63 = vpop.f32.mrf.mxu0 }
 0x1e0   :  { %v1275_v40 = vpop.f32.mrf.mxu3 }
 0x1e1   :  { %v1276_v20 = vadd.f32 %v1275_v40, %v1210_v22 }
 0x1e2   :  { %v1251_v1 = vpop.f32.mrf.mxu1 }
 0x1e3   :  { %v1252_v16 = vadd.f32 %v1251_v1, %v1186_v63  ;;  %1295 = vst [vmem:[#allocation2 + $0x70] sm:$0xff] %v1276_v20 }
 0x1e5   :  { %1287 = vst [vmem:[#allocation2 + $0x30] sm:$0xff] %v1252_v16 }
 0x1ec   :  { %v1213_v54 = vpop.f32.mrf.mxu2 }
 0x1ee   :  { %v1189_v45 = vpop.f32.mrf.mxu0 }
 0x1f1   :  { %v1278_v59 = vpop.f32.mrf.mxu3 }
 0x1f2   :  { %v1254_v41 = vpop.f32.mrf.mxu1  ;;  %v1279_v27 = vadd.f32 %v1278_v59, %v1213_v54 }
 0x1f3   :  { %v1255_v53 = vadd.f32 %v1254_v41, %v1189_v45 }
 0x1f4   :  { %1296 = vst [vmem:[#allocation2 + $0x78] sm:$0xff] %v1279_v27 }
 0x1f5   :  { %1288 = vst [vmem:[#allocation2 + $0x38] sm:$0xff] %v1255_v53 }
 0x1f6   :  { %1309 = dma.vmem_to_hbm [thread:$0]  %s1302_s6, 2048, %s1304_s8, [#allocation3], %s1491_s9, %s1491_s9, %s1492_s10  }
 0x1f7   :  { %1488 = dma.done.wait [#allocation3], 2048  }
 0x1f8   :  { %1489 = vsyncadd [#allocation3], 4294965248 }
 0x1f9   :  { %1314 = vsyncpa [#allocation3], 1 }

</bundles_post_ra>
